<compile_context>
chip_gen: v7x
topology: tpu7x:2x2x1
jax: 0.10.0
libtpu: 0.0.40
codegen_flags: <defaults>
</compile_context>

<pallas_src>
import jax
import jax.numpy as jnp
from jax import lax
from jax.experimental import pallas as pl
from jax.experimental.pallas import tpu as pltpu

BN_EPS = 1e-5


def fused_conv_bn_relu_kernel(x_ref, w_ref, gamma_ref, beta_ref, o_ref,
                              conv_ref, sum_ref, sq_ref):
    """Fused 3x3 conv (pad=1) + training-mode BatchNorm + ReLU.

    Grid (N,) "arbitrary" — sequential sweep over images:
      every step n : conv image n -> VMEM scratch, accumulate sum / sumsq
      last step    : fold BN into per-channel scale/shift and emit the whole
                     activated batch as lane-dense (N, F, H*W) (NCHW-contiguous).

    x_ref:     (H, W, C)     bf16  un-padded NHWC image (halo built in-kernel)
    w_ref:     (3, 3C, Fp)   bf16  weights grouped by kernel row dy
    gamma_ref: (1, Fp)       f32
    beta_ref:  (1, Fp)       f32
    o_ref:     (N, F, H*W)   f32   resident output block (written once)
    conv_ref:  (N, H, W, Fp) f32   persistent conv-activation scratch
    sum_ref:   (1, Fp)       f32   persistent per-channel sum
    sq_ref:    (1, Fp)       f32   persistent per-channel sum of squares
    """
    n = pl.program_id(0)
    H, W, C = x_ref.shape
    Fp = w_ref.shape[-1]
    N, F, HW = o_ref.shape

    @pl.when(n == 0)
    def _init():
        sum_ref[...] = jnp.zeros_like(sum_ref)
        sq_ref[...] = jnp.zeros_like(sq_ref)

    # ---- zero halo built from values in-kernel (no wrapper jnp.pad pass) ----
    x = x_ref[...]
    zrow = jnp.zeros((1, W, C), x.dtype)
    zcol = jnp.zeros((H + 2, 1, C), x.dtype)
    xp = jnp.concatenate([zrow, x, zrow], axis=0)       # (H+2, W,   C)
    xp = jnp.concatenate([zcol, xp, zcol], axis=1)      # (H+2, W+2, C)

    # ---- 3x3 conv as 3 accumulating MXU matmuls (one per kernel row dy), ----
    # ---- K = 3*C each, f32 accumulation; avoids the (H, W, 9C) im2col.   ----
    acc = jnp.zeros((H, W, Fp), jnp.float32)
    for dy in range(3):
        rows = xp[dy:dy + H]                            # (H, W+2, C)
        patches = jnp.concatenate(
            [rows[:, dx:dx + W, :] for dx in range(3)], axis=-1)   # (H, W, 3C)
        acc = acc + lax.dot_general(
            patches, w_ref[dy],
            dimension_numbers=(((2,), (0,)), ((), ())),
            preferred_element_type=jnp.float32)

    conv_ref[n] = acc                                   # stays in VMEM only

    # ---- single-pass BN statistics accumulated across the batch sweep ----
    sum_ref[...] += jnp.sum(acc, axis=(0, 1)).reshape(1, Fp)
    sq_ref[...] += jnp.sum(acc * acc, axis=(0, 1)).reshape(1, Fp)

    # ---- last image: fold BN, apply scale/shift + ReLU, emit output ----
    @pl.when(n == N - 1)
    def _finalize():
        inv_m = 1.0 / (N * H * W)
        mean = sum_ref[...] * inv_m                             # (1, Fp)
        var = jnp.maximum(sq_ref[...] * inv_m - mean * mean, 0.0)
        scale = gamma_ref[...] * lax.rsqrt(var + BN_EPS)        # (1, Fp)
        shift = beta_ref[...] - mean * scale                    # (1, Fp)
        s = scale.reshape(1, 1, Fp)
        t = shift.reshape(1, 1, Fp)
        for i in range(N):                                      # static unroll
            y = jnp.maximum(conv_ref[i] * s + t, 0.0)           # (H, W, Fp)
            yt = jnp.transpose(y.reshape(HW, Fp), (1, 0))       # (Fp, HW) XLU
            o_ref[i] = yt[:F, :]                                # lane-dense


@jax.jit
def convolutional_layer(x_nchw, w_oihw, bias, gamma, beta):
    """PyTorch-equivalent forward: NCHW f32 in, NCHW f32 out."""
    del bias  # exactly cancelled by the training-mode batch-mean subtraction
    N, C, H, W = x_nchw.shape
    F = w_oihw.shape[0]
    Fp = ((F + 127) // 128) * 128        # lane-dense filter axis (VMEM only)

    # One fused XLA pass: NCHW -> NHWC + cast to bf16 MXU operands.
    x_nhwc = jnp.transpose(x_nchw, (0, 2, 3, 1)).astype(jnp.bfloat16)

    # OIHW -> (kh, kw, C, F) -> (3, 3C, Fp): grouped by kernel row for the
    # in-kernel 3-matmul accumulation; filter axis zero-padded to 128 lanes.
    # (K = 3C = 12 left unpadded: sub-16-row K is a minor MXU inefficiency at
    #  C = 4 and the kernel is memory/overhead bound, not MXU bound.)
    w_rows = jnp.transpose(w_oihw, (2, 3, 1, 0)).reshape(3, 3 * C, F)
    w_rows = jnp.pad(w_rows, ((0, 0), (0, 0), (0, Fp - F))).astype(jnp.bfloat16)

    gamma_p = jnp.pad(gamma.astype(jnp.float32), (0, Fp - F)).reshape(1, Fp)
    beta_p = jnp.pad(beta.astype(jnp.float32), (0, Fp - F)).reshape(1, Fp)

    out_flat = pl.pallas_call(
        fused_conv_bn_relu_kernel,
        out_shape=jax.ShapeDtypeStruct((N, F, H * W), jnp.float32),
        grid=(N,),
        in_specs=[
            pl.BlockSpec((None, H, W, C), lambda n: (n, 0, 0, 0)),
            pl.BlockSpec((3, 3 * C, Fp), lambda n: (0, 0, 0)),
            pl.BlockSpec((1, Fp), lambda n: (0, 0)),
            pl.BlockSpec((1, Fp), lambda n: (0, 0)),
        ],
        # Whole-batch output block stays resident in VMEM across the sweep and
        # is written back to HBM exactly once, with only the F real channels.
        out_specs=pl.BlockSpec((N, F, H * W), lambda n: (0, 0, 0)),
        scratch_shapes=[
            pltpu.VMEM((N, H, W, Fp), jnp.float32),   # conv activations
            pltpu.VMEM((1, Fp), jnp.float32),         # per-channel sum
            pltpu.VMEM((1, Fp), jnp.float32),         # per-channel sum of sq.
        ],
        compiler_params=pltpu.CompilerParams(
            # BN statistics + the resident output make the batch sweep a
            # sequential reduction.  TODO(synk): for large N*H*W, add a
            # row-tile "parallel" grid axis (v7x megacore) and re-tile the
            # conv scratch instead of keeping the whole batch resident.
            dimension_semantics=("arbitrary",),
            vmem_limit_bytes=32 * 1024 * 1024,
        ),
    )(x_nhwc, w_rows, gamma_p, beta_p)

    # (N, F, H*W) is already NCHW-contiguous: this reshape is free (no copy).
    return out_flat.reshape(N, F, H, W)


def reference(x_nchw, w_oihw, bias, gamma, beta, matmul_dtype=jnp.float32):
    """Plain-XLA reference; matmul_dtype controls the conv operand precision."""
    y = lax.conv_general_dilated(
        x_nchw.astype(matmul_dtype), w_oihw.astype(matmul_dtype),
        window_strides=(1, 1), padding=((1, 1), (1, 1)),
        dimension_numbers=('NCHW', 'OIHW', 'NCHW'),
        preferred_element_type=jnp.float32,
        precision=lax.Precision.HIGHEST)
    y = y + bias.reshape(1, -1, 1, 1)
    mean = jnp.mean(y, axis=(0, 2, 3), keepdims=True)
    var = jnp.mean((y - mean) ** 2, axis=(0, 2, 3), keepdims=True)
    y = (y - mean) * lax.rsqrt(var + BN_EPS)
    y = y * gamma.reshape(1, -1, 1, 1) + beta.reshape(1, -1, 1, 1)
    return jnp.maximum(y, 0.0)


if __name__ == "__main__":
    # Shapes consistent with ConvolutionalLayer(input_channels=4, num_filters=16)
    N, C, H, W = 2, 4, 16, 16
    F = 16

    key = jax.random.PRNGKey(0)
    kx, kw, kb = jax.random.split(key, 3)
    x = jax.random.normal(kx, (N, C, H, W), jnp.float32)
    w = jax.random.normal(kw, (F, C, 3, 3), jnp.float32) * 0.1   # OIHW
    b = jax.random.normal(kb, (F,), jnp.float32) * 0.1
    gamma = jnp.ones((F,), jnp.float32)    # nn.BatchNorm2d default weight
    beta = jnp.zeros((F,), jnp.float32)    # nn.BatchNorm2d default bias

    out = jax.block_until_ready(convolutional_layer(x, w, b, gamma, beta))

    assert out.shape == (N, F, H, W)
    assert bool(jnp.all(jnp.isfinite(out)))

    # Precision-matched reference (bf16 conv operands, f32 accumulation).
    ref_bf16 = reference(x, w, b, gamma, beta, matmul_dtype=jnp.bfloat16)
    assert jnp.allclose(out, ref_bf16, atol=2e-4, rtol=2e-4), \
        float(jnp.max(jnp.abs(out - ref_bf16)))

    # Full-f32 reference: bf16 MXU operands keep the error at the 1e-3 level.
    ref_f32 = reference(x, w, b, gamma, beta, matmul_dtype=jnp.float32)
    assert jnp.allclose(out, ref_f32, atol=5e-2, rtol=5e-2), \
        float(jnp.max(jnp.abs(out - ref_f32)))

    print("KERNEL_OK")
</pallas_src>

<mosaic_0001>
module attributes {stable_mosaic.version = 11 : i64} {
  func.func @fused_conv_bn_relu_kernel(%arg0: i32, %arg1: memref<1x16x16x4xbf16, #tpu.memory_space<vmem>>, %arg2: memref<3x12x128xbf16, #tpu.memory_space<vmem>>, %arg3: memref<1x128xf32, #tpu.memory_space<vmem>>, %arg4: memref<1x128xf32, #tpu.memory_space<vmem>>, %arg5: memref<2x16x256xf32, #tpu.memory_space<vmem>>, %arg6: memref<2x16x16x128xf32, #tpu.memory_space<vmem>>, %arg7: memref<1x128xf32, #tpu.memory_space<vmem>>, %arg8: memref<1x128xf32, #tpu.memory_space<vmem>>) attributes {dimension_semantics = [#tpu.dimension_semantics<arbitrary>], iteration_bounds = array<i64: 2>, scalar_prefetch = 0 : i64, scratch_operands = 3 : i64, tpu.core_type = #tpu.core_type<tc>, window_params = [{transform_indices = @transform_0, window_bounds = array<i64: 1, 16, 16, 4>}, {pipeline_mode = #tpu.pipeline_mode<synchronous>, transform_indices = @transform_1, window_bounds = array<i64: 3, 12, 128>}, {pipeline_mode = #tpu.pipeline_mode<synchronous>, transform_indices = @transform_2, window_bounds = array<i64: 1, 128>}, {pipeline_mode = #tpu.pipeline_mode<synchronous>, transform_indices = @transform_3, window_bounds = array<i64: 1, 128>}, {pipeline_mode = #tpu.pipeline_mode<synchronous>, transform_indices = @transform_4, window_bounds = array<i64: 2, 16, 256>}]} {
    %c0_i32 = arith.constant 0 : i32
    %0 = arith.cmpi eq, %arg0, %c0_i32 : i32
    %1 = arith.extui %0 : i1 to i32
    %c0_i32_0 = arith.constant 0 : i32
    %2 = arith.cmpi ne, %1, %c0_i32_0 : i32
    scf.if %2 {
      %cst_30 = arith.constant 0.000000e+00 : f32
      %55 = vector.broadcast %cst_30 : f32 to vector<1x128xf32>
      %c0_31 = arith.constant 0 : index
      %c0_32 = arith.constant 0 : index
      %56 = vector.load %arg7[%c0_31, %c0_32] : memref<1x128xf32, #tpu.memory_space<vmem>>, vector<1x128xf32>
      tpu.vector_store %arg7[%c0_31, %c0_32], %55 {strides = array<i32>} : memref<1x128xf32, #tpu.memory_space<vmem>>, vector<1x128xf32>,
      %cst_33 = arith.constant 0.000000e+00 : f32
      %57 = vector.broadcast %cst_33 : f32 to vector<1x128xf32>
      %c0_34 = arith.constant 0 : index
      %c0_35 = arith.constant 0 : index
      %58 = vector.load %arg8[%c0_34, %c0_35] : memref<1x128xf32, #tpu.memory_space<vmem>>, vector<1x128xf32>
      tpu.vector_store %arg8[%c0_34, %c0_35], %57 {strides = array<i32>} : memref<1x128xf32, #tpu.memory_space<vmem>>, vector<1x128xf32>,
    } else {
    }
    %c0 = arith.constant 0 : index
    %c0_1 = arith.constant 0 : index
    %c0_2 = arith.constant 0 : index
    %c0_3 = arith.constant 0 : index
    %3 = vector.load %arg1[%c0, %c0_1, %c0_2, %c0_3] : memref<1x16x16x4xbf16, #tpu.memory_space<vmem>>, vector<1x16x16x4xbf16>
    %4 = vector.shape_cast %3 : vector<1x16x16x4xbf16> to vector<16x16x4xbf16>
    %cst = arith.constant 0.000000e+00 : bf16
    %5 = vector.broadcast %cst : bf16 to vector<1x16x4xbf16>
    %cst_4 = arith.constant 0.000000e+00 : bf16
    %6 = vector.broadcast %cst_4 : bf16 to vector<18x1x4xbf16>
    %7 = tpu.concatenate %5, %4, %5 in 0 : vector<1x16x4xbf16>, vector<16x16x4xbf16>, vector<1x16x4xbf16> -> vector<18x16x4xbf16>
    %8 = tpu.concatenate %6, %7, %6 in 1 : vector<18x1x4xbf16>, vector<18x16x4xbf16>, vector<18x1x4xbf16> -> vector<18x18x4xbf16>
    %cst_5 = arith.constant 0.000000e+00 : f32
    %9 = vector.broadcast %cst_5 : f32 to vector<16x16x128xf32>
    %10 = vector.extract_strided_slice %8 {offsets = [0, 0, 0], sizes = [16, 18, 4], strides = [1, 1, 1]} : vector<18x18x4xbf16> to vector<16x18x4xbf16>
    %11 = vector.extract_strided_slice %10 {offsets = [0, 0, 0], sizes = [16, 16, 4], strides = [1, 1, 1]} : vector<16x18x4xbf16> to vector<16x16x4xbf16>
    %12 = vector.extract_strided_slice %10 {offsets = [0, 1, 0], sizes = [16, 16, 4], strides = [1, 1, 1]} : vector<16x18x4xbf16> to vector<16x16x4xbf16>
    %13 = vector.extract_strided_slice %10 {offsets = [0, 2, 0], sizes = [16, 16, 4], strides = [1, 1, 1]} : vector<16x18x4xbf16> to vector<16x16x4xbf16>
    %14 = tpu.concatenate %11, %12, %13 in 2 : vector<16x16x4xbf16>, vector<16x16x4xbf16>, vector<16x16x4xbf16> -> vector<16x16x12xbf16>
    %c0_6 = arith.constant 0 : index
    %c0_7 = arith.constant 0 : index
    %c0_8 = arith.constant 0 : index
    %15 = vector.load %arg2[%c0_6, %c0_7, %c0_8] : memref<3x12x128xbf16, #tpu.memory_space<vmem>>, vector<1x12x128xbf16>
    %16 = vector.shape_cast %15 : vector<1x12x128xbf16> to vector<12x128xbf16>
    %cst_9 = arith.constant dense<0.000000e+00> : vector<16x16x128xf32>
    %17 = tpu.matmul %14, %16, %cst_9 {dimension_numbers = #tpu.dot_dimension_numbers<[2], [0], [0, 1], [1], [0, 0, 0, 1, 1, 1], [], []>} : vector<16x16x12xbf16>, vector<12x128xbf16>, vector<16x16x128xf32> -> vector<16x16x128xf32>
    %18 = arith.addf %9, %17 : vector<16x16x128xf32>
    %19 = vector.extract_strided_slice %8 {offsets = [1, 0, 0], sizes = [16, 18, 4], strides = [1, 1, 1]} : vector<18x18x4xbf16> to vector<16x18x4xbf16>
    %20 = vector.extract_strided_slice %19 {offsets = [0, 0, 0], sizes = [16, 16, 4], strides = [1, 1, 1]} : vector<16x18x4xbf16> to vector<16x16x4xbf16>
    %21 = vector.extract_strided_slice %19 {offsets = [0, 1, 0], sizes = [16, 16, 4], strides = [1, 1, 1]} : vector<16x18x4xbf16> to vector<16x16x4xbf16>
    %22 = vector.extract_strided_slice %19 {offsets = [0, 2, 0], sizes = [16, 16, 4], strides = [1, 1, 1]} : vector<16x18x4xbf16> to vector<16x16x4xbf16>
    %23 = tpu.concatenate %20, %21, %22 in 2 : vector<16x16x4xbf16>, vector<16x16x4xbf16>, vector<16x16x4xbf16> -> vector<16x16x12xbf16>
    %c1 = arith.constant 1 : index
    %c0_10 = arith.constant 0 : index
    %c0_11 = arith.constant 0 : index
    %24 = vector.load %arg2[%c1, %c0_10, %c0_11] : memref<3x12x128xbf16, #tpu.memory_space<vmem>>, vector<1x12x128xbf16>
    %25 = vector.shape_cast %24 : vector<1x12x128xbf16> to vector<12x128xbf16>
    %cst_12 = arith.constant dense<0.000000e+00> : vector<16x16x128xf32>
    %26 = tpu.matmul %23, %25, %cst_12 {dimension_numbers = #tpu.dot_dimension_numbers<[2], [0], [0, 1], [1], [0, 0, 0, 1, 1, 1], [], []>} : vector<16x16x12xbf16>, vector<12x128xbf16>, vector<16x16x128xf32> -> vector<16x16x128xf32>
    %27 = arith.addf %18, %26 : vector<16x16x128xf32>
    %28 = vector.extract_strided_slice %8 {offsets = [2, 0, 0], sizes = [16, 18, 4], strides = [1, 1, 1]} : vector<18x18x4xbf16> to vector<16x18x4xbf16>
    %29 = vector.extract_strided_slice %28 {offsets = [0, 0, 0], sizes = [16, 16, 4], strides = [1, 1, 1]} : vector<16x18x4xbf16> to vector<16x16x4xbf16>
    %30 = vector.extract_strided_slice %28 {offsets = [0, 1, 0], sizes = [16, 16, 4], strides = [1, 1, 1]} : vector<16x18x4xbf16> to vector<16x16x4xbf16>
    %31 = vector.extract_strided_slice %28 {offsets = [0, 2, 0], sizes = [16, 16, 4], strides = [1, 1, 1]} : vector<16x18x4xbf16> to vector<16x16x4xbf16>
    %32 = tpu.concatenate %29, %30, %31 in 2 : vector<16x16x4xbf16>, vector<16x16x4xbf16>, vector<16x16x4xbf16> -> vector<16x16x12xbf16>
    %c2 = arith.constant 2 : index
    %c0_13 = arith.constant 0 : index
    %c0_14 = arith.constant 0 : index
    %33 = vector.load %arg2[%c2, %c0_13, %c0_14] : memref<3x12x128xbf16, #tpu.memory_space<vmem>>, vector<1x12x128xbf16>
    %34 = vector.shape_cast %33 : vector<1x12x128xbf16> to vector<12x128xbf16>
    %cst_15 = arith.constant dense<0.000000e+00> : vector<16x16x128xf32>
    %35 = tpu.matmul %32, %34, %cst_15 {dimension_numbers = #tpu.dot_dimension_numbers<[2], [0], [0, 1], [1], [0, 0, 0, 1, 1, 1], [], []>} : vector<16x16x12xbf16>, vector<12x128xbf16>, vector<16x16x128xf32> -> vector<16x16x128xf32>
    %36 = arith.addf %27, %35 : vector<16x16x128xf32>
    %37 = arith.index_cast %arg0 : i32 to index
    %c0_16 = arith.constant 0 : index
    %c0_17 = arith.constant 0 : index
    %c0_18 = arith.constant 0 : index
    %38 = vector.load %arg6[%37, %c0_16, %c0_17, %c0_18] : memref<2x16x16x128xf32, #tpu.memory_space<vmem>>, vector<1x16x16x128xf32>
    %39 = vector.shape_cast %38 : vector<1x16x16x128xf32> to vector<16x16x128xf32>
    %40 = vector.shape_cast %36 : vector<16x16x128xf32> to vector<1x16x16x128xf32>
    tpu.vector_store %arg6[%37, %c0_16, %c0_17, %c0_18], %40 {strides = array<i32>} : memref<2x16x16x128xf32, #tpu.memory_space<vmem>>, vector<1x16x16x128xf32>,
    %c0_19 = arith.constant 0 : index
    %c0_20 = arith.constant 0 : index
    %41 = vector.load %arg7[%c0_19, %c0_20] : memref<1x128xf32, #tpu.memory_space<vmem>>, vector<1x128xf32>
    %cst_21 = arith.constant dense<0.000000e+00> : vector<128xf32>
    %42 = vector.multi_reduction <add>, %36, %cst_21 [0, 1] : vector<16x16x128xf32> to vector<128xf32>
    %43 = vector.shape_cast %42 : vector<128xf32> to vector<1x128xf32>
    %44 = arith.addf %41, %43 : vector<1x128xf32>
    %c0_22 = arith.constant 0 : index
    %c0_23 = arith.constant 0 : index
    %45 = vector.load %arg7[%c0_22, %c0_23] : memref<1x128xf32, #tpu.memory_space<vmem>>, vector<1x128xf32>
    tpu.vector_store %arg7[%c0_22, %c0_23], %44 {strides = array<i32>} : memref<1x128xf32, #tpu.memory_space<vmem>>, vector<1x128xf32>,
    %c0_24 = arith.constant 0 : index
    %c0_25 = arith.constant 0 : index
    %46 = vector.load %arg8[%c0_24, %c0_25] : memref<1x128xf32, #tpu.memory_space<vmem>>, vector<1x128xf32>
    %47 = arith.mulf %36, %36 : vector<16x16x128xf32>
    %cst_26 = arith.constant dense<0.000000e+00> : vector<128xf32>
    %48 = vector.multi_reduction <add>, %47, %cst_26 [0, 1] : vector<16x16x128xf32> to vector<128xf32>
    %49 = vector.shape_cast %48 : vector<128xf32> to vector<1x128xf32>
    %50 = arith.addf %46, %49 : vector<1x128xf32>
    %c0_27 = arith.constant 0 : index
    %c0_28 = arith.constant 0 : index
    %51 = vector.load %arg8[%c0_27, %c0_28] : memref<1x128xf32, #tpu.memory_space<vmem>>, vector<1x128xf32>
    tpu.vector_store %arg8[%c0_27, %c0_28], %50 {strides = array<i32>} : memref<1x128xf32, #tpu.memory_space<vmem>>, vector<1x128xf32>,
    %c1_i32 = arith.constant 1 : i32
    %52 = arith.cmpi eq, %arg0, %c1_i32 : i32
    %53 = arith.extui %52 : i1 to i32
    %c0_i32_29 = arith.constant 0 : i32
    %54 = arith.cmpi ne, %53, %c0_i32_29 : i32
    scf.if %54 {
      %c0_30 = arith.constant 0 : index
      %c0_31 = arith.constant 0 : index
      %55 = vector.load %arg7[%c0_30, %c0_31] : memref<1x128xf32, #tpu.memory_space<vmem>>, vector<1x128xf32>
      %cst_32 = arith.constant 0.001953125 : f32
      %56 = vector.broadcast %cst_32 : f32 to vector<1x128xf32>
      %57 = arith.mulf %55, %56 : vector<1x128xf32>
      %c0_33 = arith.constant 0 : index
      %c0_34 = arith.constant 0 : index
      %58 = vector.load %arg8[%c0_33, %c0_34] : memref<1x128xf32, #tpu.memory_space<vmem>>, vector<1x128xf32>
      %cst_35 = arith.constant 0.001953125 : f32
      %59 = vector.broadcast %cst_35 : f32 to vector<1x128xf32>
      %60 = arith.mulf %58, %59 : vector<1x128xf32>
      %61 = arith.mulf %57, %57 : vector<1x128xf32>
      %62 = arith.subf %60, %61 : vector<1x128xf32>
      %cst_36 = arith.constant 0.000000e+00 : f32
      %63 = vector.broadcast %cst_36 : f32 to vector<1x128xf32>
      %64 = arith.maximumf %62, %63 : vector<1x128xf32>
      %c0_37 = arith.constant 0 : index
      %c0_38 = arith.constant 0 : index
      %65 = vector.load %arg3[%c0_37, %c0_38] : memref<1x128xf32, #tpu.memory_space<vmem>>, vector<1x128xf32>
      %cst_39 = arith.constant 9.99999974E-6 : f32
      %66 = vector.broadcast %cst_39 : f32 to vector<1x128xf32>
      %67 = arith.addf %64, %66 : vector<1x128xf32>
      %68 = math.rsqrt %67 : vector<1x128xf32>
      %69 = arith.mulf %65, %68 : vector<1x128xf32>
      %c0_40 = arith.constant 0 : index
      %c0_41 = arith.constant 0 : index
      %70 = vector.load %arg4[%c0_40, %c0_41] : memref<1x128xf32, #tpu.memory_space<vmem>>, vector<1x128xf32>
      %71 = arith.mulf %57, %69 : vector<1x128xf32>
      %72 = arith.subf %70, %71 : vector<1x128xf32>
      %73 = vector.shape_cast %69 : vector<1x128xf32> to vector<1x1x128xf32>
      %74 = vector.shape_cast %72 : vector<1x128xf32> to vector<1x1x128xf32>
      %c0_42 = arith.constant 0 : index
      %c0_43 = arith.constant 0 : index
      %c0_44 = arith.constant 0 : index
      %c0_45 = arith.constant 0 : index
      %75 = vector.load %arg6[%c0_42, %c0_43, %c0_44, %c0_45] : memref<2x16x16x128xf32, #tpu.memory_space<vmem>>, vector<1x16x16x128xf32>
      %76 = vector.shape_cast %75 : vector<1x16x16x128xf32> to vector<16x16x128xf32>
      %77 = vector.broadcast %73 : vector<1x1x128xf32> to vector<16x16x128xf32>
      %78 = arith.mulf %76, %77 : vector<16x16x128xf32>
      %79 = vector.broadcast %74 : vector<1x1x128xf32> to vector<16x16x128xf32>
      %80 = arith.addf %78, %79 : vector<16x16x128xf32>
      %cst_46 = arith.constant 0.000000e+00 : f32
      %81 = vector.broadcast %cst_46 : f32 to vector<16x16x128xf32>
      %82 = arith.maximumf %80, %81 : vector<16x16x128xf32>
      %83 = vector.shape_cast %82 : vector<16x16x128xf32> to vector<256x128xf32>
      %84 = tpu.transpose %83, [1, 0] : vector<256x128xf32> -> vector<128x256xf32>
      %85 = vector.extract_strided_slice %84 {offsets = [0, 0], sizes = [16, 256], strides = [1, 1]} : vector<128x256xf32> to vector<16x256xf32>
      %c0_47 = arith.constant 0 : index
      %c0_48 = arith.constant 0 : index
      %c0_49 = arith.constant 0 : index
      %86 = vector.load %arg5[%c0_47, %c0_48, %c0_49] : memref<2x16x256xf32, #tpu.memory_space<vmem>>, vector<1x16x256xf32>
      %87 = vector.shape_cast %86 : vector<1x16x256xf32> to vector<16x256xf32>
      %88 = vector.shape_cast %85 : vector<16x256xf32> to vector<1x16x256xf32>
      tpu.vector_store %arg5[%c0_47, %c0_48, %c0_49], %88 {strides = array<i32>} : memref<2x16x256xf32, #tpu.memory_space<vmem>>, vector<1x16x256xf32>,
      %c1_50 = arith.constant 1 : index
      %c0_51 = arith.constant 0 : index
      %c0_52 = arith.constant 0 : index
      %c0_53 = arith.constant 0 : index
      %89 = vector.load %arg6[%c1_50, %c0_51, %c0_52, %c0_53] : memref<2x16x16x128xf32, #tpu.memory_space<vmem>>, vector<1x16x16x128xf32>
      %90 = vector.shape_cast %89 : vector<1x16x16x128xf32> to vector<16x16x128xf32>
      %91 = vector.broadcast %73 : vector<1x1x128xf32> to vector<16x16x128xf32>
      %92 = arith.mulf %90, %91 : vector<16x16x128xf32>
      %93 = vector.broadcast %74 : vector<1x1x128xf32> to vector<16x16x128xf32>
      %94 = arith.addf %92, %93 : vector<16x16x128xf32>
      %cst_54 = arith.constant 0.000000e+00 : f32
      %95 = vector.broadcast %cst_54 : f32 to vector<16x16x128xf32>
      %96 = arith.maximumf %94, %95 : vector<16x16x128xf32>
      %97 = vector.shape_cast %96 : vector<16x16x128xf32> to vector<256x128xf32>
      %98 = tpu.transpose %97, [1, 0] : vector<256x128xf32> -> vector<128x256xf32>
      %99 = vector.extract_strided_slice %98 {offsets = [0, 0], sizes = [16, 256], strides = [1, 1]} : vector<128x256xf32> to vector<16x256xf32>
      %c1_55 = arith.constant 1 : index
      %c0_56 = arith.constant 0 : index
      %c0_57 = arith.constant 0 : index
      %100 = vector.load %arg5[%c1_55, %c0_56, %c0_57] : memref<2x16x256xf32, #tpu.memory_space<vmem>>, vector<1x16x256xf32>
      %101 = vector.shape_cast %100 : vector<1x16x256xf32> to vector<16x256xf32>
      %102 = vector.shape_cast %99 : vector<16x256xf32> to vector<1x16x256xf32>
      tpu.vector_store %arg5[%c1_55, %c0_56, %c0_57], %102 {strides = array<i32>} : memref<2x16x256xf32, #tpu.memory_space<vmem>>, vector<1x16x256xf32>,
    } else {
    }
    return
  }
  func.func @transform_0(%arg0: i32) -> (i32, i32, i32, i32) {
    %c0_i32 = arith.constant 0 : i32
    %c0_i32_0 = arith.constant 0 : i32
    %c0_i32_1 = arith.constant 0 : i32
    %c0_i32_2 = arith.constant 0 : i32
    return %arg0, %c0_i32, %c0_i32_0, %c0_i32_1 : i32, i32, i32, i32
  }
  func.func @transform_1(%arg0: i32) -> (i32, i32, i32) {
    %c0_i32 = arith.constant 0 : i32
    %c0_i32_0 = arith.constant 0 : i32
    %c0_i32_1 = arith.constant 0 : i32
    %c0_i32_2 = arith.constant 0 : i32
    return %c0_i32, %c0_i32_0, %c0_i32_1 : i32, i32, i32
  }
  func.func @transform_2(%arg0: i32) -> (i32, i32) {
    %c0_i32 = arith.constant 0 : i32
    %c0_i32_0 = arith.constant 0 : i32
    %c0_i32_1 = arith.constant 0 : i32
    return %c0_i32, %c0_i32_0 : i32, i32
  }
  func.func @transform_3(%arg0: i32) -> (i32, i32) {
    %c0_i32 = arith.constant 0 : i32
    %c0_i32_0 = arith.constant 0 : i32
    %c0_i32_1 = arith.constant 0 : i32
    return %c0_i32, %c0_i32_0 : i32, i32
  }
  func.func @transform_4(%arg0: i32) -> (i32, i32, i32) {
    %c0_i32 = arith.constant 0 : i32
    %c0_i32_0 = arith.constant 0 : i32
    %c0_i32_1 = arith.constant 0 : i32
    %c0_i32_2 = arith.constant 0 : i32
    return %c0_i32, %c0_i32_0, %c0_i32_1 : i32, i32, i32
  }
}

</mosaic_0001>

<bundles_post_ra>
// kernel: convolutional_layer.1
= control target key start
LH: loop header
LB: loop body
LE: loop exit
PB: predicated region body
PF: predicated region fallthrough
CT: control target
= control target key end

     0   :  { %s2484_s15 = smov 0   ;;  %s3204_s0 = inlined_call_operand.vmem [shape: bf16[2,16,16,4], index: 0, kind: input, shape index: {}]   ;;  %s3205_s1 = inlined_call_operand.vmem [shape: bf16[3,12,128], index: 1, kind: input, shape index: {}]   ;;  %s3206_s2 = inlined_call_operand.vmem [shape: f32[1,128], index: 2, kind: input, shape index: {}]   ;;  %s3207_s3 = inlined_call_operand.vmem [shape: f32[1,128], index: 3, kind: input, shape index: {}]   ;;  %s3208_s4 = inlined_call_operand.vmem [shape: f32[2,16,256], index: 4, kind: output, shape index: {}]  }
   0x1 LB: > { %s2490_s16 = sadd.s32 4294967295, %s2453_s15   ;;  %p2107_p0 = scmp.ge.s32.totalorder %s2453_s15, 1  ;;  %s2453_s15 = sphi %s2484_s15, %s14_s15  }
   0x2   : > { %p157_p1 = scmp.lt.s32.totalorder %s2453_s15, 3 }
   0x4   : > { %p158_p2 = pnand %p2107_p0, %p157_p1 }
   0x5   : > { %p178_p3 = scmp.lt.s32.totalorder (!%p158_p2), %s2490_s16, 1  ;;  %p2110_p4 = scmp.ne.s32.totalorder (!%p158_p2), %s2490_s16, 0 }
   0x6   : > { %161 = sbr.rel (%p158_p2) target bundleno = 724 (0x2d4), region = 36 }
   0xd   : > { %s179_s17 = scalar_select %p178_p3, %s2490_s16, 1 }
   0xe   : > { %187 = sbr.rel (%p2110_p4) target bundleno = 21 (0x15), region = 40  ;;  %v2455_v0 = vmov (!%p2110_p4), 0.0  }
   0xf   : > { %s2190_s18 = sshll.u32 %s179_s17, 7  ;;  %188 = vst [vmem:[#allocation3] sm:$0x1] (!%p2110_p4), %v2455_v0  ;;  %189 = vst [vmem:[#allocation4] sm:$0x1] (!%p2110_p4), %v2455_v0 }
  0x10   : > { %s2499_s21 = scalar_lea.vmem %s3204_s0, %s2190_s18 }
  0x15 PF: > { %vm455_vm0 = vcmask 1040384   ;;  %vm456_vm1 = vsmask.f32 256  ;;  %v2456_v1 = vmov 0   ;;  %vm749_vm3 = vcmask 1046528   ;;  %v2426_v4 = vld [vmem:[%s2499_s21 + $0x8] sm:$0xff]  }
  0x16   : > { %v305_v2 = vrot.slane %v2456_v1, 7  ;;  %vm2502_vm2 = vmand %vm455_vm0, %vm456_vm1  ;;  %vm492_vm4 = vsmask.f32 7424  ;;  %v2427_v7 = vld [vmem:[%s2499_s21] sm:$0xff]   ;;  %v2428_v8 = vld [vmem:[%s2499_s21 + $0x18] sm:$0xff]   ;;  %v317_v14 = vshrl.u32 %v2426_v4, 16 }
  0x17   : > { %v320_v15 = vshll.u32 %v2426_v4, 16  ;;  %v310_v16 = vshrl.u32 %v2427_v7, 16  ;;  %v313_v19 = vshll.u32 %v2427_v7, 16  ;;  %v331_v20 = vshrl.u32 %v2428_v8, 16  ;;  %v2429_v21 = vld [vmem:[%s2499_s21 + $0x10] sm:$0xff]   ;;  %s2457_s22 = smov 8  }
  0x18   : > { %v2509_v5 = vsel %vm2502_vm2, 0, %v305_v2  ;;  %v475_v6 = vsel %vm2502_vm2, %v305_v2, 0  ;;  %v319_v23 = vrot.slane %v317_v14, 7  ;;  %v334_v25 = vshll.u32 %v2428_v8, 16  ;;  %s2458_s23 = smov 4   ;;  %v2430_v57 = vld [vmem:[%s2499_s21 + $0x28] sm:$0xff]  }
  0x19   : > { %v750_v9 = vrot.slane %v2509_v5, 1  ;;  %v751_v10 = vrot.slane %v475_v6, 1  ;;  %v494_v11 = vshrl.u32 %v2509_v5, 16  ;;  %v496_v12 = vshll.u32 %v2509_v5, 16  ;;  %v2431_v2 = vld [vmem:[%s2499_s21 + $0x20] sm:$0xff]   ;;  %v2566_v14 = vld [vmem:[%s2499_s21 + $0x30] sm:$0xff]  }
  0x1a   : > { %v501_v13 = vshll.u32 %v475_v6, 16  ;;  %v312_v24 = vrot.slane %v310_v16, 7  ;;  %v333_v27 = vrot.slane %v331_v20, 7  ;;  %v324_v28 = vshrl.u32 %v2429_v21, 16  ;;  %s2182_s30 = sshll.u32 %s2490_s16, 8  ;;  %p2183_p5 = scmp.ne.s32.totalorder %s2490_s16, 1 }
  0x1b   : > { %v752_v17 = vsel %vm749_vm3, %v750_v9, %v751_v10  ;;  %v498_v18 = vrot.slane %v496_v12, 1  ;;  %v322_v29 = vor.u32 %v320_v15, %v319_v23  ;;  %v477_v30 = vsel %vm2502_vm2, %v319_v23, 0  ;;  %v2432_v9 = vld [vmem:[%s2499_s21 + $0x38] sm:$0xff]   ;;  %s2885_s5 = scalar_lea.vmem [#allocation2], %s2182_s30 }
  0x1c   : > { %798 = vrot.lane.b32.xlu1 %v752_v17, %s2457_s22  ;;  %v503_v22 = vrot.slane %v501_v13, 1  ;;  %v315_v31 = vor.u32 %v313_v19, %v312_v24  ;;  %v476_v32 = vsel %vm2502_vm2, %v312_v24, 0  ;;  %v525_v34 = vshll.u32 %v477_v30, 16 }
  0x1d   : > { %v499_v26 = vor.u32 %v498_v18, %v494_v11  ;;  %v513_v35 = vshll.u32 %v476_v32, 16  ;;  %v327_v36 = vshll.u32 %v2429_v21, 16  ;;  %v2529_v37 = vsel %vm2502_vm2, 0, %v322_v29 }
  0x1e   : > { %v2533_v38 = vsel %vm2502_vm2, 0, %v315_v31  ;;  %v757_v39 = vrot.slane %v477_v30, 1  ;;  %v336_v40 = vor.u32 %v334_v25, %v333_v27  ;;  %v518_v41 = vshrl.u32 %v2529_v37, 16  ;;  %v2574_v30 = vld [vmem:[%s2499_s21 + $0x48] sm:$0xff]  }
  0x1f   : > { %v504_v33 = vsel %vm492_vm4, %v499_v26, %v503_v22  ;;  %v520_v42 = vshll.u32 %v2529_v37, 16  ;;  %v527_v43 = vrot.slane %v525_v34, 1  ;;  %v754_v44 = vrot.slane %v476_v32, 1 }
  0x20   : > { %685 = vrot.lane.b32.xlu0 %v504_v33, %s2458_s23  ;;  %v506_v45 = vshrl.u32 %v2533_v38, 16  ;;  %v508_v46 = vshll.u32 %v2533_v38, 16  ;;  %v515_v47 = vrot.slane %v513_v35, 1  ;;  %v756_v48 = vrot.slane %v2529_v37, 1 }
  0x21   : > { %v522_v49 = vrot.slane %v520_v42, 1  ;;  %v2542_v50 = vsel %vm2502_vm2, 0, %v336_v40  ;;  %v479_v51 = vsel %vm2502_vm2, %v333_v27, 0  ;;  %v326_v52 = vrot.slane %v324_v28, 7 }
  0x22   : > { %v510_v53 = vrot.slane %v508_v46, 1  ;;  %v758_v54 = vsel %vm749_vm3, %v756_v48, %v757_v39  ;;  %v753_v55 = vrot.slane %v2533_v38, 1  ;;  %v542_v56 = vshrl.u32 %v2542_v50, 16 }
  0x23   : > { %v523_v58 = vor.u32 %v522_v49, %v518_v41  ;;  %v544_v59 = vshll.u32 %v2542_v50, 16  ;;  %v549_v60 = vshll.u32 %v479_v51, 16  ;;  %v329_v61 = vor.u32 %v327_v36, %v326_v52 }
  0x24   : > { %v511_v62 = vor.u32 %v510_v53, %v506_v45  ;;  %v478_v63 = vsel %vm2502_vm2, %v326_v52, 0  ;;  %v762_v0 = vrot.slane %v2542_v50, 1  ;;  %v763_v1 = vrot.slane %v479_v51, 1 }
  0x25   : > { %v528_v4 = vsel %vm492_vm4, %v523_v58, %v527_v43  ;;  %v546_v6 = vrot.slane %v544_v59, 1  ;;  %v551_v7 = vrot.slane %v549_v60, 1  ;;  %v2558_v8 = vsel %vm2502_vm2, 0, %v329_v61 }
  0x26   : > { %689 = vrot.lane.b32.xlu1 %v528_v4, %s2458_s23  ;;  %v516_v10 = vsel %vm492_vm4, %v511_v62, %v515_v47  ;;  %v530_v11 = vshrl.u32 %v2558_v8, 16  ;;  %v532_v12 = vshll.u32 %v2558_v8, 16  ;;  %v537_v13 = vshll.u32 %v478_v63, 16 }
  0x27   : > { %687 = vrot.lane.b32.xlu0 %v516_v10, %s2458_s23  ;;  %v755_v15 = vsel %vm749_vm3, %v753_v55, %v754_v44  ;;  %v547_v16 = vor.u32 %v546_v6, %v542_v56  ;;  %v759_v17 = vrot.slane %v2558_v8, 1  ;;  %v760_v18 = vrot.slane %v478_v63, 1 }
  0x28   : > { %v534_v19 = vrot.slane %v532_v12, 1  ;;  %v539_v20 = vrot.slane %v537_v13, 1  ;;  %v345_v21 = vshrl.u32 %v2430_v57, 16  ;;  %v348_v22 = vshll.u32 %v2430_v57, 16 }
  0x29   : > { %v764_v23 = vsel %vm749_vm3, %v762_v0, %v763_v1  ;;  %v338_v24 = vshrl.u32 %v2431_v2, 16  ;;  %v341_v25 = vshll.u32 %v2431_v2, 16  ;;  %v359_v28 = vshrl.u32 %v2432_v9, 16 }
  0x2a   : > { %802 = vrot.lane.b32.xlu1 %v758_v54, %s2457_s22  ;;  %v535_v26 = vor.u32 %v534_v19, %v530_v11  ;;  %v347_v27 = vrot.slane %v345_v21, 7  ;;  %v362_v29 = vshll.u32 %v2432_v9, 16  ;;  %v552_v31 = vsel %vm492_vm4, %v547_v16, %v551_v7 }
  0x2b   : > { %800 = vrot.lane.b32.xlu0 %v755_v15, %s2457_s22  ;;  %v761_v32 = vsel %vm749_vm3, %v759_v17, %v760_v18  ;;  %v340_v33 = vrot.slane %v338_v24, 7  ;;  %v352_v34 = vshrl.u32 %v2566_v14, 16  ;;  %v361_v40 = vrot.slane %v359_v28, 7  ;;  %v2435_v17 = vld [vmem:[%s2499_s21 + $0x40] sm:$0xff]  }
  0x2c   : > { %v540_v35 = vsel %vm492_vm4, %v535_v26, %v539_v20  ;;  %v350_v36 = vor.u32 %v348_v22, %v347_v27  ;;  %v481_v39 = vsel %vm2502_vm2, %v347_v27, 0  ;;  %v355_v44 = vshll.u32 %v2566_v14, 16  ;;  %v2436_v26 = vld [vmem:[%s2499_s21 + $0x58] sm:$0xff]  }
  0x2d   : > { %v573_v41 = vshll.u32 %v481_v39, 16  ;;  %v343_v42 = vor.u32 %v341_v25, %v340_v33  ;;  %v480_v43 = vsel %vm2502_vm2, %v340_v33, 0  ;;  %v364_v47 = vor.u32 %v362_v29, %v361_v40 }
  0x2e   : > { %693 = vrot.lane.b32.xlu1 %v552_v31, %s2458_s23  ;;  %v2589_v45 = vsel %vm2502_vm2, 0, %v350_v36  ;;  %v561_v46 = vshll.u32 %v480_v43, 16  ;;  %v373_v48 = vshrl.u32 %v2574_v30, 16  ;;  %v769_v53 = vrot.slane %v481_v39, 1 }
  0x2f   : > { %691 = vrot.lane.b32.xlu0 %v540_v35, %s2458_s23  ;;  %v566_v49 = vshrl.u32 %v2589_v45, 16  ;;  %v568_v51 = vshll.u32 %v2589_v45, 16  ;;  %v2597_v52 = vsel %vm2502_vm2, 0, %v343_v42  ;;  %v575_v54 = vrot.slane %v573_v41, 1 }
  0x30   : > { %v554_v55 = vshrl.u32 %v2597_v52, 16  ;;  %v556_v56 = vshll.u32 %v2597_v52, 16  ;;  %v766_v57 = vrot.slane %v480_v43, 1  ;;  %v563_v59 = vrot.slane %v561_v46, 1 }
  0x31   : > { %v570_v58 = vrot.slane %v568_v51, 1  ;;  %v2603_v60 = vsel %vm2502_vm2, 0, %v364_v47  ;;  %v483_v61 = vsel %vm2502_vm2, %v361_v40, 0  ;;  %v768_v63 = vrot.slane %v2589_v45, 1 }
  0x32   : > { %806 = vrot.lane.b32.xlu1 %v764_v23, %s2457_s22  ;;  %v558_v62 = vrot.slane %v556_v56, 1  ;;  %v590_v0 = vshrl.u32 %v2603_v60, 16  ;;  %v592_v1 = vshll.u32 %v2603_v60, 16  ;;  %v765_v4 = vrot.slane %v2597_v52, 1  ;;  %v2437_v56 = vld [vmem:[%s2499_s21 + $0x50] sm:$0xff]  }
  0x33   : > { %804 = vrot.lane.b32.xlu0 %v761_v32, %s2457_s22  ;;  %v571_v2 = vor.u32 %v570_v58, %v566_v49  ;;  %v597_v6 = vshll.u32 %v483_v61, 16  ;;  %v354_v7 = vrot.slane %v352_v34, 7  ;;  %v774_v11 = vrot.slane %v2603_v60, 1 }
  0x34   : > { %v559_v9 = vor.u32 %v558_v62, %v554_v55  ;;  %v594_v10 = vrot.slane %v592_v1, 1  ;;  %v775_v12 = vrot.slane %v483_v61, 1  ;;  %v770_v19 = vsel %vm749_vm3, %v768_v63, %v769_v53 }
  0x35   : > { %v576_v13 = vsel %vm492_vm4, %v571_v2, %v575_v54  ;;  %v599_v14 = vrot.slane %v597_v6, 1  ;;  %v357_v15 = vor.u32 %v355_v44, %v354_v7  ;;  %v482_v16 = vsel %vm2502_vm2, %v354_v7, 0 }
  0x36   : > { %697 = vrot.lane.b32.xlu1 %v576_v13, %s2458_s23  ;;  %v564_v18 = vsel %vm492_vm4, %v559_v9, %v563_v59  ;;  %v595_v20 = vor.u32 %v594_v10, %v590_v0  ;;  %v585_v21 = vshll.u32 %v482_v16, 16  ;;  %v767_v22 = vsel %vm749_vm3, %v765_v4, %v766_v57  ;;  %v2438_v13 = vld [vmem:[%s2499_s21 + $0x68] sm:$0xff]  }
  0x37   : > { %695 = vrot.lane.b32.xlu0 %v564_v18, %s2458_s23  ;;  %v2625_v23 = vsel %vm2502_vm2, 0, %v357_v15  ;;  %v375_v24 = vrot.slane %v373_v48, 7  ;;  %v376_v25 = vshll.u32 %v2574_v30, 16  ;;  %v776_v29 = vsel %vm749_vm3, %v774_v11, %v775_v12 }
  0x38   : > { %v578_v27 = vshrl.u32 %v2625_v23, 16  ;;  %v580_v28 = vshll.u32 %v2625_v23, 16  ;;  %v772_v31 = vrot.slane %v482_v16, 1  ;;  %v600_v32 = vsel %vm492_vm4, %v595_v20, %v599_v14 }
  0x39   : > { %v378_v33 = vor.u32 %v376_v25, %v375_v24  ;;  %v485_v34 = vsel %vm2502_vm2, %v375_v24, 0  ;;  %v366_v35 = vshrl.u32 %v2435_v17, 16  ;;  %v587_v39 = vrot.slane %v585_v21, 1 }
  0x3a   : > { %810 = vrot.lane.b32.xlu1 %v770_v19, %s2457_s22  ;;  %v582_v36 = vrot.slane %v580_v28, 1  ;;  %v771_v30 = vrot.slane %v2625_v23, 1  ;;  %v369_v40 = vshll.u32 %v2435_v17, 16  ;;  %v621_v42 = vshll.u32 %v485_v34, 16 }
  0x3b   : > { %808 = vrot.lane.b32.xlu0 %v767_v22, %s2457_s22  ;;  %v2640_v41 = vsel %vm2502_vm2, 0, %v378_v33  ;;  %v368_v43 = vrot.slane %v366_v35, 7  ;;  %v387_v44 = vshrl.u32 %v2436_v26, 16  ;;  %v781_v49 = vrot.slane %v485_v34, 1  ;;  %v2439_v22 = vld [vmem:[%s2499_s21 + $0x60] sm:$0xff]  }
  0x3c   : > { %v583_v46 = vor.u32 %v582_v36, %v578_v27  ;;  %v614_v47 = vshrl.u32 %v2640_v41, 16  ;;  %v616_v48 = vshll.u32 %v2640_v41, 16  ;;  %v780_v54 = vrot.slane %v2640_v41, 1 }
  0x3d   : > { %v371_v51 = vor.u32 %v369_v40, %v368_v43  ;;  %v484_v53 = vsel %vm2502_vm2, %v368_v43, 0  ;;  %v389_v55 = vrot.slane %v387_v44, 7  ;;  %v773_v58 = vsel %vm749_vm3, %v771_v30, %v772_v31 }
  0x3e   : > { %701 = vrot.lane.b32.xlu1 %v600_v32, %s2458_s23  ;;  %v588_v57 = vsel %vm492_vm4, %v583_v46, %v587_v39  ;;  %v618_v59 = vrot.slane %v616_v48, 1  ;;  %v609_v61 = vshll.u32 %v484_v53, 16  ;;  %v623_v62 = vrot.slane %v621_v42, 1 }
  0x3f   : > { %699 = vrot.lane.b32.xlu0 %v588_v57, %s2458_s23  ;;  %v2654_v63 = vsel %vm2502_vm2, 0, %v371_v51  ;;  %v390_v0 = vshll.u32 %v2436_v26, 16  ;;  %v2658_v1 = vsel %vm2502_vm2, %v389_v55, 0  ;;  %v778_v7 = vrot.slane %v484_v53, 1 }
  0x40   : > { %v619_v2 = vor.u32 %v618_v59, %v614_v47  ;;  %v602_v4 = vshrl.u32 %v2654_v63, 16  ;;  %v604_v6 = vshll.u32 %v2654_v63, 16  ;;  %v782_v9 = vsel %vm749_vm3, %v780_v54, %v781_v49 }
  0x41   : > { %v777_v10 = vrot.slane %v2654_v63, 1  ;;  %v392_v11 = vor.u32 %v390_v0, %v389_v55  ;;  %v380_v12 = vshrl.u32 %v2437_v56, 16  ;;  %v611_v15 = vrot.slane %v609_v61, 1  ;;  %v2441_v0 = vld [vmem:[%s2499_s21 + $0x78] sm:$0xff]  }
  0x42   : > { %814 = vrot.lane.b32.xlu1 %v776_v29, %s2457_s22  ;;  %v606_v14 = vrot.slane %v604_v6, 1  ;;  %v645_v16 = vshll.u32 %v2658_v1, 16  ;;  %v383_v17 = vshll.u32 %v2437_v56, 16  ;;  %v624_v18 = vsel %vm492_vm4, %v619_v2, %v623_v62 }
  0x43   : > { %812 = vrot.lane.b32.xlu0 %v773_v58, %s2457_s22  ;;  %v2671_v19 = vsel %vm2502_vm2, 0, %v392_v11  ;;  %v382_v20 = vrot.slane %v380_v12, 7  ;;  %v787_v21 = vrot.slane %v2658_v1, 1  ;;  %v779_v25 = vsel %vm749_vm3, %v777_v10, %v778_v7  ;;  %v2440_v58 = vld [vmem:[%s2499_s21 + $0x70] sm:$0xff]  }
  0x44   : > { %v607_v24 = vor.u32 %v606_v14, %v602_v4  ;;  %v638_v26 = vshrl.u32 %v2671_v19, 16  ;;  %v640_v27 = vshll.u32 %v2671_v19, 16  ;;  %v401_v31 = vshrl.u32 %v2438_v13, 16 }
  0x45   : > { %v385_v28 = vor.u32 %v383_v17, %v382_v20  ;;  %v486_v29 = vsel %vm2502_vm2, %v382_v20, 0  ;;  %v404_v32 = vshll.u32 %v2438_v13, 16  ;;  %v647_v35 = vrot.slane %v645_v16, 1 }
  0x46   : > { %705 = vrot.lane.b32.xlu1 %v624_v18, %s2458_s23  ;;  %v612_v33 = vsel %vm492_vm4, %v607_v24, %v611_v15  ;;  %v642_v34 = vrot.slane %v640_v27, 1  ;;  %v633_v36 = vshll.u32 %v486_v29, 16  ;;  %v786_v30 = vrot.slane %v2671_v19, 1 }
  0x47   : > { %703 = vrot.lane.b32.xlu0 %v612_v33, %s2458_s23  ;;  %v2685_v39 = vsel %vm2502_vm2, 0, %v385_v28  ;;  %v403_v40 = vrot.slane %v401_v31, 7  ;;  %v394_v42 = vshrl.u32 %v2439_v22, 16  ;;  %v784_v47 = vrot.slane %v486_v29, 1 }
  0x48   : > { %v643_v43 = vor.u32 %v642_v34, %v638_v26  ;;  %v626_v44 = vshrl.u32 %v2685_v39, 16  ;;  %v628_v46 = vshll.u32 %v2685_v39, 16  ;;  %v783_v48 = vrot.slane %v2685_v39, 1  ;;  %v2442_v34 = vld [vmem:[%s3205_s1 + $0x8] sm:$0x3f]  }
  0x49   : > { %v406_v49 = vor.u32 %v404_v32, %v403_v40  ;;  %v489_v51 = vsel %vm2502_vm2, %v403_v40, 0  ;;  %v396_v53 = vrot.slane %v394_v42, 7  ;;  %v635_v55 = vrot.slane %v633_v36, 1  ;;  %v2443_v42 = vld [vmem:[%s3205_s1] sm:$0x3f]  }
  0x4a   : > { %818 = vrot.lane.b32.xlu1 %v782_v9, %s2457_s22  ;;  %v630_v54 = vrot.slane %v628_v46, 1  ;;  %v669_v56 = vshll.u32 %v489_v51, 16  ;;  %v397_v57 = vshll.u32 %v2439_v22, 16  ;;  %v648_v59 = vsel %vm492_vm4, %v643_v43, %v647_v35 }
  0x4b   : > { %816 = vrot.lane.b32.xlu0 %v779_v25, %s2457_s22  ;;  %v2699_v61 = vsel %vm2502_vm2, 0, %v406_v49  ;;  %v488_v62 = vsel %vm2502_vm2, %v396_v53, 0  ;;  %v788_v6 = vsel %vm749_vm3, %v786_v30, %v787_v21  ;;  %v785_v7 = vsel %vm749_vm3, %v783_v48, %v784_v47 }
  0x4c   : > { %v631_v1 = vor.u32 %v630_v54, %v626_v44  ;;  %v662_v2 = vshrl.u32 %v2699_v61, 16  ;;  %v664_v4 = vshll.u32 %v2699_v61, 16  ;;  %v671_v9 = vrot.slane %v669_v56, 1 }
  0x4d   : > { %v399_v10 = vor.u32 %v397_v57, %v396_v53  ;;  %v657_v13 = vshll.u32 %v488_v62, 16  ;;  %v408_v14 = vshrl.u32 %v2440_v58, 16  ;;  %v793_v16 = vrot.slane %v489_v51, 1  ;;  %v2444_v51 = vld [vmem:[%s3205_s1 + $0x10] sm:$0x3f]  }
  0x4e   : > { %709 = vrot.lane.b32.xlu1 %v648_v59, %s2458_s23  ;;  %v636_v11 = vsel %vm492_vm4, %v631_v1, %v635_v55  ;;  %v666_v12 = vrot.slane %v664_v4, 1  ;;  %v411_v17 = vshll.u32 %v2440_v58, 16  ;;  %v415_v18 = vshrl.u32 %v2441_v0, 16 }
  0x4f   : > { %707 = vrot.lane.b32.xlu0 %v636_v11, %s2458_s23  ;;  %v2713_v15 = vsel %vm2502_vm2, 0, %v399_v10  ;;  %v792_v24 = vrot.slane %v2699_v61, 1  ;;  %v790_v25 = vrot.slane %v488_v62, 1  ;;  %v410_v26 = vrot.slane %v408_v14, 7 }
  0x50   : > { %v667_v20 = vor.u32 %v666_v12, %v662_v2  ;;  %v650_v21 = vshrl.u32 %v2713_v15, 16  ;;  %v652_v22 = vshll.u32 %v2713_v15, 16  ;;  %v417_v27 = vrot.slane %v415_v18, 7 }
  0x51   : > { %v418_v28 = vshll.u32 %v2441_v0, 16  ;;  %v659_v32 = vrot.slane %v657_v13, 1  ;;  %v789_v33 = vrot.slane %v2713_v15, 1  ;;  %v413_v35 = vor.u32 %v411_v17, %v410_v26 }
  0x52   : > { %822 = vrot.lane.b32.xlu1 %v788_v6, %s2457_s22  ;;  %v672_v29 = vsel %vm492_vm4, %v667_v20, %v671_v9  ;;  %v654_v31 = vrot.slane %v652_v22, 1  ;;  %v490_v36 = vsel %vm2502_vm2, %v410_v26, 0  ;;  %v491_v40 = vsel %vm2502_vm2, %v417_v27, 0 }
  0x53   : > { %820 = vrot.lane.b32.xlu0 %v785_v7, %s2457_s22  ;;  %v420_v30 = vor.u32 %v418_v28, %v417_v27  ;;  %v794_v44 = vsel %vm749_vm3, %v792_v24, %v793_v16  ;;  %v681_v46 = vshll.u32 %v490_v36, 16  ;;  %v2735_v47 = vsel %vm2502_vm2, 0, %v413_v35 }
  0x54   : > { %v655_v43 = vor.u32 %v654_v31, %v650_v21  ;;  %v906_v49 = vshll.u32 %v491_v40, 16  ;;  %vm964_vm5 = vcmask 1045504   ;;  %v791_v54 = vsel %vm749_vm3, %v789_v33, %v790_v25 }
  0x55   : > { %v2739_v48 = vsel %vm2502_vm2, 0, %v420_v30  ;;  %v674_v55 = vshrl.u32 %v2735_v47, 16  ;;  %v676_v56 = vshll.u32 %v2735_v47, 16  ;;  %2410 = vmatprep.subr.msk.bf16.mxu1 %vm964_vm5, %v2442_v34  ;;  %v795_v3 = vrot.slane %v2735_v47, 1  ;;  %2411 = vmatprep.subr.msk.bf16.mxu0 %vm964_vm5, %v2443_v42 }
  0x56   : > { %713 = vrot.lane.b32.xlu1 %v672_v29, %s2458_s23  ;;  %v660_v53 = vsel %vm492_vm4, %v655_v43, %v659_v32  ;;  %v796_v57 = vrot.slane %v490_v36, 1  ;;  %v899_v58 = vshrl.u32 %v2739_v48, 16  ;;  %v901_v59 = vshll.u32 %v2739_v48, 16 }
  0x57   : > { %711 = vrot.lane.b32.xlu0 %v660_v53, %s2458_s23  ;;  %v678_v62 = vrot.slane %v676_v56, 1  ;;  %v683_v0 = vrot.slane %v681_v46, 1  ;;  %v966_v1 = vsel %vm964_vm5, %v2442_v34, 0  ;;  %v1137_v2 = vsel %vm964_vm5, %v2443_v42, 0 }
  0x58   : > { %v903_v4 = vrot.slane %v901_v59, 1  ;;  %v908_v6 = vrot.slane %v906_v49, 1  ;;  %2243 = vmatpush3.bf16.msra.mxu1 %v966_v1  ;;  %2277 = vmatpush3.bf16.msra.mxu0 %v1137_v2  ;;  %v1309_v7 = vsel %vm964_vm5, %v2444_v51, 0  ;;  %v797_v10 = vsel %vm749_vm3, %v795_v3, %v796_v57 }
  0x59   : > { %v679_v9 = vor.u32 %v678_v62, %v674_v55  ;;  %2412 = vmatprep.subr.msk.bf16.mxu1 %vm964_vm5, %v2443_v42  ;;  %v914_v12 = vrot.slane %v2739_v48, 1  ;;  %v915_v13 = vrot.slane %v491_v40, 1  ;;  %2413 = vmatprep.subr.msk.bf16.mxu0 %vm964_vm5, %v2444_v51  ;;  %vm830_vm6 = vcmask 31744  }
  0x5a   : > { %826 = vrot.lane.b32.xlu1 %v794_v44, %s2457_s22  ;;  %v904_v11 = vor.u32 %v903_v4, %v899_v58  ;;  %vm863_vm7 = vcmask 64512   ;;  %vm931_vm8 = vcmask 97280  }
  0x5b   : > { %824 = vrot.lane.b32.xlu0 %v791_v54, %s2457_s22  ;;  %v684_v14 = vsel %vm492_vm4, %v679_v9, %v683_v0  ;;  %v916_v17 = vsel %vm749_vm3, %v914_v12, %v915_v13 }
  0x5c   : > { %v909_v16 = vsel %vm492_vm4, %v904_v11, %v908_v6 }
  0x5e   : > { %828 = vrot.lane.b32.xlu1 %v797_v10, %s2457_s22 }
  0x5f   : > { %715 = vrot.lane.b32.xlu0 %v684_v14, %s2458_s23 }
  0x62   : > { %917 = vrot.lane.b32.xlu1 %v916_v17, %s2457_s22 }
  0x63   : > { %910 = vrot.lane.b32.xlu0 %v909_v16, %s2458_s23 }
  0x8e   : > { %v799_v18 = vpop.permute.xlu1 %798 }
  0x92   : > { %v686_v20 = vpop.permute.xlu0 %685 }
  0x93   : > { %v832_v21 = vsel %vm830_vm6, %v2509_v5, %v686_v20 }
  0x94   : > { %v2774_v22 = vsel %vm863_vm7, %v832_v21, %v799_v18 }
  0x95   : > { %2278 = vmatprep.mubr.msk.bf16.mxu0 %vm931_vm8, %v2774_v22 }
  0x98   : > { %v690_v24 = vpop.permute.xlu1 %689 }
  0x99   : > { %v688_v25 = vpop.permute.xlu0 %687  ;;  %v836_v26 = vsel %vm830_vm6, %v2529_v37, %v690_v24 }
  0x9a   : > { %v834_v28 = vsel %vm830_vm6, %v2533_v38, %v688_v25 }
  0x9c   : > { %v803_v27 = vpop.permute.xlu1 %802 }
  0x9d   : > { %v869_v29 = vsel %vm863_vm7, %v836_v26, %v803_v27  ;;  %v801_v31 = vpop.permute.xlu0 %800 }
  0x9e   : > { %v867_v5 = vsel %vm863_vm7, %v834_v28, %v801_v31 }
  0x9f   : > { %2244 = vmatprep.mubr.msk.bf16.mxu1 %vm931_vm8, %v867_v5  ;;  %2279 = vmatmul.mubr.msk.bf16.vlgmr.msra.gmra.mrb[0].mxu0 %vm931_vm8, %v867_v5 }
  0xa0   : > { %2245 = vmatmul.mubr.msk.bf16.vlgmr.msra.gmra.mrb[0].mxu1 %vm931_vm8, %v869_v29  ;;  %2282 = vmatprep.mubr.msk.bf16.mxu0 %vm931_vm8, %v869_v29  ;;  %v694_v32 = vpop.permute.xlu1 %693 }
  0xa1   : > { %2345 = vmatpush3.bf16.msra.mxu1 %v1137_v2  ;;  %2311 = vmatpush3.bf16.msra.mxu0 %v1309_v7  ;;  %v692_v37 = vpop.permute.xlu0 %691  ;;  %v840_v38 = vsel %vm830_vm6, %v2542_v50, %v694_v32 }
  0xa2   : > { %v838_v34 = vsel %vm830_vm6, %v2558_v8, %v692_v37 }
  0xa4   : > { %v807_v33 = vpop.permute.xlu1 %806 }
  0xa5   : > { %v873_v35 = vsel %vm863_vm7, %v840_v38, %v807_v33  ;;  %v805_v36 = vpop.permute.xlu0 %804 }
  0xa6   : > { %v871_v30 = vsel %vm863_vm7, %v838_v34, %v805_v36 }
  0xa7   : > { %2248 = vmatprep.mubr.msk.bf16.mxu1 %vm931_vm8, %v871_v30  ;;  %2283 = vmatmul.mubr.msk.bf16.gmra.mrb[4].mxu0 %vm931_vm8, %v871_v30 }
  0xa8   : > { %2249 = vmatmul.mubr.msk.bf16.gmra.mrb[4].mxu1 %vm931_vm8, %v873_v35  ;;  %2286 = vmatprep.mubr.msk.bf16.mxu0 %vm931_vm8, %v873_v35  ;;  %v698_v40 = vpop.permute.xlu1 %697 }
  0xa9   : > { %v696_v42 = vpop.permute.xlu0 %695  ;;  %v844_v50 = vsel %vm830_vm6, %v2589_v45, %v698_v40 }
  0xaa   : > { %v842_v8 = vsel %vm830_vm6, %v2597_v52, %v696_v42 }
  0xac   : > { %v811_v43 = vpop.permute.xlu1 %810 }
  0xad   : > { %v877_v44 = vsel %vm863_vm7, %v844_v50, %v811_v43  ;;  %v809_v46 = vpop.permute.xlu0 %808 }
  0xae   : > { %v875_v49 = vsel %vm863_vm7, %v842_v8, %v809_v46 }
  0xaf   : > { %2252 = vmatprep.mubr.msk.bf16.mxu1 %vm931_vm8, %v875_v49  ;;  %2287 = vmatmul.mubr.msk.bf16.gmra.mrb[8].mxu0 %vm931_vm8, %v875_v49 }
  0xb0   : > { %2253 = vmatmul.mubr.msk.bf16.gmra.mrb[8].mxu1 %vm931_vm8, %v877_v44  ;;  %2290 = vmatprep.mubr.msk.bf16.mxu0 %vm931_vm8, %v877_v44  ;;  %v702_v51 = vpop.permute.xlu1 %701 }
  0xb1   : > { %v700_v53 = vpop.permute.xlu0 %699  ;;  %v848_v45 = vsel %vm830_vm6, %v2603_v60, %v702_v51 }
  0xb2   : > { %v846_v52 = vsel %vm830_vm6, %v2625_v23, %v700_v53 }
  0xb4   : > { %v815_v54 = vpop.permute.xlu1 %814 }
  0xb5   : > { %v881_v55 = vsel %vm863_vm7, %v848_v45, %v815_v54  ;;  %v813_v56 = vpop.permute.xlu0 %812 }
  0xb6   : > { %v879_v3 = vsel %vm863_vm7, %v846_v52, %v813_v56 }
  0xb7   : > { %2256 = vmatprep.mubr.msk.bf16.mxu1 %vm931_vm8, %v879_v3  ;;  %2291 = vmatmul.mubr.msk.bf16.gmra.mrb[12].mxu0 %vm931_vm8, %v879_v3 }
  0xb8   : > { %2257 = vmatmul.mubr.msk.bf16.gmra.mrb[12].mxu1 %vm931_vm8, %v881_v55  ;;  %2312 = vmatprep.mubr.msk.bf16.mxu0 %vm931_vm8, %v869_v29  ;;  %v706_v57 = vpop.permute.xlu1 %705 }
  0xb9   : > { %v704_v58 = vpop.permute.xlu0 %703  ;;  %v852_v60 = vsel %vm830_vm6, %v2640_v41, %v706_v57 }
  0xba   : > { %v850_v23 = vsel %vm830_vm6, %v2654_v63, %v704_v58 }
  0xbc   : > { %v819_v59 = vpop.permute.xlu1 %818 }
  0xbd   : > { %v885_v62 = vsel %vm863_vm7, %v852_v60, %v819_v59  ;;  %v817_v0 = vpop.permute.xlu0 %816 }
  0xbe   : > { %v883_v1 = vsel %vm863_vm7, %v850_v23, %v817_v0 }
  0xbf   : > { %2260 = vmatprep.mubr.msk.bf16.mxu1 %vm931_vm8, %v883_v1  ;;  %2313 = vmatmul.mubr.msk.bf16.vlgmr.msra.gmra.mrb[0].mxu0 %vm931_vm8, %v871_v30 }
  0xc0   : > { %2261 = vmatmul.mubr.msk.bf16.gmra.mrb[16].mxu1 %vm931_vm8, %v885_v62  ;;  %2316 = vmatprep.mubr.msk.bf16.mxu0 %vm931_vm8, %v873_v35  ;;  %v710_v2 = vpop.permute.xlu1 %709 }
  0xc1   : > { %v708_v4 = vpop.permute.xlu0 %707  ;;  %v856_v41 = vsel %vm830_vm6, %v2671_v19, %v710_v2 }
  0xc2   : > { %v854_v63 = vsel %vm830_vm6, %v2685_v39, %v708_v4 }
  0xc4   : > { %v823_v6 = vpop.permute.xlu1 %822 }
  0xc5   : > { %v889_v7 = vsel %vm863_vm7, %v856_v41, %v823_v6  ;;  %v821_v9 = vpop.permute.xlu0 %820 }
  0xc6   : > { %v887_v10 = vsel %vm863_vm7, %v854_v63, %v821_v9 }
  0xc7   : > { %2264 = vmatprep.mubr.msk.bf16.mxu1 %vm931_vm8, %v887_v10  ;;  %2317 = vmatmul.mubr.msk.bf16.gmra.mrb[4].mxu0 %vm931_vm8, %v875_v49 }
  0xc8   : > { %2265 = vmatmul.mubr.msk.bf16.gmra.mrb[20].mxu1 %vm931_vm8, %v889_v7  ;;  %2320 = vmatprep.mubr.msk.bf16.mxu0 %vm931_vm8, %v877_v44  ;;  %v714_v11 = vpop.permute.xlu1 %713 }
  0xc9   : > { %v712_v12 = vpop.permute.xlu0 %711  ;;  %v860_v19 = vsel %vm830_vm6, %v2699_v61, %v714_v11 }
  0xca   : > { %v858_v39 = vsel %vm830_vm6, %v2713_v15, %v712_v12 }
  0xcc   : > { %v827_v13 = vpop.permute.xlu1 %826 }
  0xcd   : > { %v893_v14 = vsel %vm863_vm7, %v860_v19, %v827_v13  ;;  %v825_v16 = vpop.permute.xlu0 %824 }
  0xce   : > { %v891_v17 = vsel %vm863_vm7, %v858_v39, %v825_v16 }
  0xcf   : > { %2268 = vmatprep.mubr.msk.bf16.mxu1 %vm931_vm8, %v891_v17  ;;  %2321 = vmatmul.mubr.msk.bf16.gmra.mrb[8].mxu0 %vm931_vm8, %v879_v3 }
  0xd0   : > { %2269 = vmatmul.mubr.msk.bf16.gmra.mrb[24].mxu1 %vm931_vm8, %v893_v14  ;;  %2324 = vmatprep.mubr.msk.bf16.mxu0 %vm931_vm8, %v881_v55  ;;  %v829_v18 = vpop.permute.xlu1 %828 }
  0xd1   : > { %v716_v20 = vpop.permute.xlu0 %715 }
  0xd2   : > { %v862_v61 = vsel %vm830_vm6, %v2735_v47, %v716_v20 }
  0xd3   : > { %v895_v15 = vsel %vm863_vm7, %v862_v61, %v829_v18 }
  0xd4   : > { %2272 = vmatprep.mubr.msk.bf16.mxu1 %vm931_vm8, %v895_v15  ;;  %v918_v21 = vpop.permute.xlu1 %917 }
  0xd5   : > { %v911_v24 = vpop.permute.xlu0 %910 }
  0xd6   : > { %v920_v25 = vsel %vm830_vm6, %v2739_v48, %v911_v24 }
  0xd7   : > { %v922_v26 = vsel %vm863_vm7, %v920_v25, %v918_v21  ;;  %2325 = vmatmul.mubr.msk.bf16.gmra.mrb[12].mxu0 %vm931_vm8, %v883_v1 }
  0xd8   : > { %2273 = vmatmul.mubr.msk.bf16.gmra.mrb[28].mxu1 %vm931_vm8, %v922_v26  ;;  %2328 = vmatprep.mubr.msk.bf16.mxu0 %vm931_vm8, %v885_v62 }
  0xd9   : > { %2294 = vmatprep.mubr.msk.bf16.mxu1 %vm931_vm8, %v881_v55 }
  0xdf   : > { %2329 = vmatmul.mubr.msk.bf16.gmra.mrb[16].mxu0 %vm931_vm8, %v887_v10 }
  0xe0   : > { %2295 = vmatmul.mubr.msk.bf16.vlgmr.msra.gmra.mrb[16].mxu1 %vm931_vm8, %v883_v1  ;;  %2332 = vmatprep.mubr.msk.bf16.mxu0 %vm931_vm8, %v889_v7 }
  0xe1   : > { %2298 = vmatprep.mubr.msk.bf16.mxu1 %vm931_vm8, %v885_v62 }
  0xe7   : > { %2333 = vmatmul.mubr.msk.bf16.gmra.mrb[20].mxu0 %vm931_vm8, %v891_v17 }
  0xe8   : > { %2299 = vmatmul.mubr.msk.bf16.gmra.mrb[20].mxu1 %vm931_vm8, %v887_v10  ;;  %2336 = vmatprep.mubr.msk.bf16.mxu0 %vm931_vm8, %v893_v14 }
  0xe9   : > { %2302 = vmatprep.mubr.msk.bf16.mxu1 %vm931_vm8, %v889_v7 }
  0xef   : > { %2337 = vmatmul.mubr.msk.bf16.gmra.mrb[24].mxu0 %vm931_vm8, %v895_v15 }
  0xf0   : > { %2303 = vmatmul.mubr.msk.bf16.gmra.mrb[24].mxu1 %vm931_vm8, %v891_v17  ;;  %2340 = vmatprep.mubr.msk.bf16.mxu0 %vm931_vm8, %v922_v26 }
  0xf1   : > { %2306 = vmatprep.mubr.msk.bf16.mxu1 %vm931_vm8, %v893_v14 }
  0xf7   : > { %2341 = vmatmul.mubr.msk.bf16.gmra.mrb[28].mxu0 %vm931_vm8, %v2774_v22 }
  0xf8   : > { %2307 = vmatmul.mubr.msk.bf16.gmra.mrb[28].mxu1 %vm931_vm8, %v895_v15 }
 0x173   : > { %v2246_v47 = vpop.f32.mrb[0].mxu1 }
 0x174   : > { %v1002_v48 = vpop.f32.mrb[1].mxu1 }
 0x175   : > { %v2247_v27 = vpop.f32.mrb[2].mxu1 }
 0x176   : > { %v1005_v28 = vpop.f32.mrb[3].mxu1 }
 0x17b   : > { %v2250_v29 = vpop.f32.mrb[4].mxu1 }
 0x17c   : > { %v1018_v31 = vpop.f32.mrb[5].mxu1 }
 0x17d   : > { %v2251_v5 = vpop.f32.mrb[6].mxu1 }
 0x17e   : > { %v1021_v32 = vpop.f32.mrb[7].mxu1 }
 0x183   : > { %v2254_v37 = vpop.f32.mrb[8].mxu1 }
 0x184   : > { %v1034_v38 = vpop.f32.mrb[9].mxu1 }
 0x185   : > { %v2255_v33 = vpop.f32.mrb[10].mxu1 }
 0x186   : > { %v2874_v34 = vpop.f32.mrb[11].mxu1 }
 0x18b   : > { %v2876_v35 = vpop.f32.mrb[12].mxu1 }
 0x18c   : > { %v2878_v36 = vpop.f32.mrb[13].mxu1 }
 0x18d   : > { %v2880_v22 = vpop.f32.mrb[14].mxu1 }
 0x18e   : > { %v2882_v30 = vpop.f32.mrb[15].mxu1 }
 0x192   : > { %v2314_v40 = vpop.f32.mrb[0].mxu0 }
 0x193   : > { %v2346_v42 = vadd.f32 %v2314_v40, %v2246_v47  ;;  %v1345_v50 = vpop.f32.mrb[1].mxu0 }
 0x194   : > { %v2347_v43 = vadd.f32 %v1345_v50, %v1002_v48  ;;  %v2315_v8 = vpop.f32.mrb[2].mxu0 }
 0x195   : > { %1508 = vst [vmem:[%s2885_s5 + $0x10] sm:$0xff] %v2346_v42  ;;  %v2348_v44 = vadd.f32 %v2315_v8, %v2247_v27  ;;  %v1348_v46 = vpop.f32.mrb[3].mxu0  ;;  %v1581_v54 = vmul.f32 %v2346_v42, %v2346_v42 }
 0x196   : > { %1506 = vst [vmem:[%s2885_s5] sm:$0xff] %v2347_v43  ;;  %v2349_v49 = vadd.f32 %v1348_v46, %v1005_v28  ;;  %v1579_v51 = vmul.f32 %v2347_v43, %v2347_v43 }
 0x197   : > { %1509 = vst [vmem:[%s2885_s5 + $0x18] sm:$0xff] %v2348_v44  ;;  %v1582_v58 = vmul.f32 %v2348_v44, %v2348_v44 }
 0x198   : > { %1507 = vst [vmem:[%s2885_s5 + $0x8] sm:$0xff] %v2349_v49  ;;  %v1539_v53 = vadd.f32 %v2349_v49, %v2347_v43  ;;  %v1580_v45 = vmul.f32 %v2349_v49, %v2349_v49 }
 0x19a   : > { %v1540_v52 = vadd.f32 %v2346_v42, %v1539_v53  ;;  %v1611_v55 = vadd.f32 %v1580_v45, %v1579_v51  ;;  %v2318_v56 = vpop.f32.mrb[4].mxu0 }
 0x19b   : > { %v2350_v3 = vadd.f32 %v2318_v56, %v2250_v29  ;;  %v1361_v57 = vpop.f32.mrb[5].mxu0 }
 0x19c   : > { %v1612_v60 = vadd.f32 %v1611_v55, %v1581_v54  ;;  %v2351_v59 = vadd.f32 %v1361_v57, %v1018_v31  ;;  %v1541_v23 = vadd.f32 %v2348_v44, %v1540_v52  ;;  %v2319_v62 = vpop.f32.mrb[6].mxu0 }
 0x19d   : > { %1512 = vst [vmem:[%s2885_s5 + $0x30] sm:$0xff] %v2350_v3  ;;  %v2352_v0 = vadd.f32 %v2319_v62, %v2251_v5  ;;  %v1364_v1 = vpop.f32.mrb[7].mxu0  ;;  %v1585_v10 = vmul.f32 %v2350_v3, %v2350_v3 }
 0x19e   : > { %1510 = vst [vmem:[%s2885_s5 + $0x20] sm:$0xff] %v2351_v59  ;;  %v1542_v2 = vadd.f32 %v2351_v59, %v1541_v23  ;;  %v1583_v4 = vmul.f32 %v2351_v59, %v2351_v59  ;;  %v1613_v41 = vadd.f32 %v1612_v60, %v1582_v58  ;;  %v2353_v6 = vadd.f32 %v1364_v1, %v1021_v32 }
 0x19f   : > { %1513 = vst [vmem:[%s2885_s5 + $0x38] sm:$0xff] %v2352_v0  ;;  %v1586_v14 = vmul.f32 %v2352_v0, %v2352_v0 }
 0x1a0   : > { %v1614_v63 = vadd.f32 %v1613_v41, %v1583_v4  ;;  %1511 = vst [vmem:[%s2885_s5 + $0x28] sm:$0xff] %v2353_v6  ;;  %v1543_v7 = vadd.f32 %v2353_v6, %v1542_v2  ;;  %v1584_v9 = vmul.f32 %v2353_v6, %v2353_v6 }
 0x1a2   : > { %v1544_v11 = vadd.f32 %v2350_v3, %v1543_v7  ;;  %v1615_v12 = vadd.f32 %v1614_v63, %v1584_v9  ;;  %v2322_v19 = vpop.f32.mrb[8].mxu0 }
 0x1a3   : > { %v2354_v13 = vadd.f32 %v2322_v19, %v2254_v37  ;;  %v1377_v39 = vpop.f32.mrb[9].mxu0 }
 0x1a4   : > { %v1616_v16 = vadd.f32 %v1615_v12, %v1585_v10  ;;  %v2355_v17 = vadd.f32 %v1377_v39, %v1034_v38  ;;  %v1545_v18 = vadd.f32 %v2352_v0, %v1544_v11  ;;  %v2323_v20 = vpop.f32.mrb[10].mxu0 }
 0x1a5   : > { %1516 = vst [vmem:[%s2885_s5 + $0x50] sm:$0xff] %v2354_v13  ;;  %v2356_v61 = vadd.f32 %v2323_v20, %v2255_v33  ;;  %v1380_v15 = vpop.f32.mrb[11].mxu0  ;;  %v1589_v28 = vmul.f32 %v2354_v13, %v2354_v13 }
 0x1a6   : > { %1514 = vst [vmem:[%s2885_s5 + $0x40] sm:$0xff] %v2355_v17  ;;  %v1546_v21 = vadd.f32 %v2355_v17, %v1545_v18  ;;  %v1587_v24 = vmul.f32 %v2355_v17, %v2355_v17  ;;  %v1617_v25 = vadd.f32 %v1616_v16, %v1586_v14  ;;  %v2357_v26 = vadd.f32 %v1380_v15, %v2874_v34 }
 0x1a7   : > { %1517 = vst [vmem:[%s2885_s5 + $0x58] sm:$0xff] %v2356_v61  ;;  %v1590_v38 = vmul.f32 %v2356_v61, %v2356_v61 }
 0x1a8   : > { %v1618_v47 = vadd.f32 %v1617_v25, %v1587_v24  ;;  %1515 = vst [vmem:[%s2885_s5 + $0x48] sm:$0xff] %v2357_v26  ;;  %v1547_v48 = vadd.f32 %v2357_v26, %v1546_v21  ;;  %v1588_v27 = vmul.f32 %v2357_v26, %v2357_v26 }
 0x1aa   : > { %v1548_v29 = vadd.f32 %v2354_v13, %v1547_v48  ;;  %v1619_v31 = vadd.f32 %v1618_v47, %v1588_v27  ;;  %v2326_v5 = vpop.f32.mrb[12].mxu0 }
 0x1ab   : > { %v2358_v32 = vadd.f32 %v2326_v5, %v2876_v35  ;;  %v1393_v37 = vpop.f32.mrb[13].mxu0 }
 0x1ac   : > { %v1620_v33 = vadd.f32 %v1619_v31, %v1589_v28  ;;  %v2359_v34 = vadd.f32 %v1393_v37, %v2878_v36  ;;  %v1549_v40 = vadd.f32 %v2356_v61, %v1548_v29  ;;  %v2327_v42 = vpop.f32.mrb[14].mxu0 }
 0x1ad   : > { %1520 = vst [vmem:[%s2885_s5 + $0x70] sm:$0xff] %v2358_v32  ;;  %v2360_v50 = vadd.f32 %v2327_v42, %v2880_v22  ;;  %v1396_v43 = vpop.f32.mrb[15].mxu0  ;;  %v1593_v45 = vmul.f32 %v2358_v32, %v2358_v32 }
 0x1ae   : > { %1518 = vst [vmem:[%s2885_s5 + $0x60] sm:$0xff] %v2359_v34  ;;  %v1550_v8 = vadd.f32 %v2359_v34, %v1549_v40  ;;  %v1591_v44 = vmul.f32 %v2359_v34, %v2359_v34  ;;  %v1621_v46 = vadd.f32 %v1620_v33, %v1590_v38  ;;  %v2361_v49 = vadd.f32 %v1396_v43, %v2882_v30 }
 0x1af   : > { %1521 = vst [vmem:[%s2885_s5 + $0x78] sm:$0xff] %v2360_v50  ;;  %v1594_v56 = vmul.f32 %v2360_v50, %v2360_v50 }
 0x1b0   : > { %v1622_v35 = vadd.f32 %v1621_v46, %v1591_v44  ;;  %1519 = vst [vmem:[%s2885_s5 + $0x68] sm:$0xff] %v2361_v49  ;;  %v1551_v51 = vadd.f32 %v2361_v49, %v1550_v8  ;;  %v1592_v53 = vmul.f32 %v2361_v49, %v2361_v49 }
 0x1b2   : > { %v1552_v36 = vadd.f32 %v2358_v32, %v1551_v51  ;;  %v1623_v54 = vadd.f32 %v1622_v35, %v1592_v53  ;;  %v2330_v52 = vpop.f32.mrb[16].mxu0 }
 0x1b3   : > { %v2296_v55 = vpop.f32.mrb[16].mxu1  ;;  %v1409_v22 = vpop.f32.mrb[17].mxu0 }
 0x1b4   : > { %v1624_v3 = vadd.f32 %v1623_v54, %v1593_v45  ;;  %v2362_v57 = vadd.f32 %v2330_v52, %v2296_v55  ;;  %v1237_v58 = vpop.f32.mrb[17].mxu1  ;;  %v1553_v30 = vadd.f32 %v2360_v50, %v1552_v36  ;;  %v2331_v60 = vpop.f32.mrb[18].mxu0 }
 0x1b5   : > { %v2363_v59 = vadd.f32 %v1409_v22, %v1237_v58  ;;  %v2297_v23 = vpop.f32.mrb[18].mxu1  ;;  %v1412_v62 = vpop.f32.mrb[19].mxu0 }
 0x1b6   : > { %1524 = vst [vmem:[%s2885_s5 + $0x90] sm:$0xff] %v2362_v57  ;;  %v1625_v0 = vadd.f32 %v1624_v3, %v1594_v56  ;;  %v2364_v1 = vadd.f32 %v2331_v60, %v2297_v23  ;;  %v1240_v2 = vpop.f32.mrb[19].mxu1  ;;  %v1597_v11 = vmul.f32 %v2362_v57, %v2362_v57 }
 0x1b7   : > { %1522 = vst [vmem:[%s2885_s5 + $0x80] sm:$0xff] %v2363_v59  ;;  %v1554_v4 = vadd.f32 %v2363_v59, %v1553_v30  ;;  %v1595_v41 = vmul.f32 %v2363_v59, %v2363_v59  ;;  %v2365_v6 = vadd.f32 %v1412_v62, %v1240_v2 }
 0x1b8   : > { %1525 = vst [vmem:[%s2885_s5 + $0x98] sm:$0xff] %v2364_v1  ;;  %v1598_v18 = vmul.f32 %v2364_v1, %v2364_v1 }
 0x1b9   : > { %v1626_v63 = vadd.f32 %v1625_v0, %v1595_v41  ;;  %1523 = vst [vmem:[%s2885_s5 + $0x88] sm:$0xff] %v2365_v6  ;;  %v1555_v7 = vadd.f32 %v2365_v6, %v1554_v4  ;;  %v1596_v9 = vmul.f32 %v2365_v6, %v2365_v6 }
 0x1ba   : > { %v2334_v10 = vpop.f32.mrb[20].mxu0 }
 0x1bb   : > { %v1556_v12 = vadd.f32 %v2362_v57, %v1555_v7  ;;  %v1627_v19 = vadd.f32 %v1626_v63, %v1596_v9  ;;  %v2300_v13 = vpop.f32.mrb[20].mxu1  ;;  %v1425_v39 = vpop.f32.mrb[21].mxu0 }
 0x1bc   : > { %v2366_v14 = vadd.f32 %v2334_v10, %v2300_v13  ;;  %v1253_v16 = vpop.f32.mrb[21].mxu1  ;;  %v2335_v17 = vpop.f32.mrb[22].mxu0 }
 0x1bd   : > { %v1628_v20 = vadd.f32 %v1627_v19, %v1597_v11  ;;  %v2367_v61 = vadd.f32 %v1425_v39, %v1253_v16  ;;  %v1557_v15 = vadd.f32 %v2364_v1, %v1556_v12  ;;  %v2301_v21 = vpop.f32.mrb[22].mxu1  ;;  %v1428_v24 = vpop.f32.mrb[23].mxu0 }
 0x1be   : > { %1528 = vst [vmem:[%s2885_s5 + $0xb0] sm:$0xff] %v2366_v14  ;;  %v2368_v25 = vadd.f32 %v2335_v17, %v2301_v21  ;;  %v1256_v26 = vpop.f32.mrb[23].mxu1  ;;  %v1601_v37 = vmul.f32 %v2366_v14, %v2366_v14 }
 0x1bf   : > { %1526 = vst [vmem:[%s2885_s5 + $0xa0] sm:$0xff] %v2367_v61  ;;  %v1558_v47 = vadd.f32 %v2367_v61, %v1557_v15  ;;  %v1599_v48 = vmul.f32 %v2367_v61, %v2367_v61  ;;  %v1629_v27 = vadd.f32 %v1628_v20, %v1598_v18  ;;  %v2369_v28 = vadd.f32 %v1428_v24, %v1256_v26 }
 0x1c0   : > { %1529 = vst [vmem:[%s2885_s5 + $0xb8] sm:$0xff] %v2368_v25  ;;  %v1602_v8 = vmul.f32 %v2368_v25, %v2368_v25 }
 0x1c1   : > { %v1630_v29 = vadd.f32 %v1629_v27, %v1599_v48  ;;  %1527 = vst [vmem:[%s2885_s5 + $0xa8] sm:$0xff] %v2369_v28  ;;  %v1559_v31 = vadd.f32 %v2369_v28, %v1558_v47  ;;  %v1600_v5 = vmul.f32 %v2369_v28, %v2369_v28 }
 0x1c2   : > { %v2338_v32 = vpop.f32.mrb[24].mxu0 }
 0x1c3   : > { %v1560_v38 = vadd.f32 %v2366_v14, %v1559_v31  ;;  %v1631_v33 = vadd.f32 %v1630_v29, %v1600_v5  ;;  %v2304_v34 = vpop.f32.mrb[24].mxu1  ;;  %v1441_v40 = vpop.f32.mrb[25].mxu0 }
 0x1c4   : > { %v2370_v42 = vadd.f32 %v2338_v32, %v2304_v34  ;;  %v1269_v50 = vpop.f32.mrb[25].mxu1  ;;  %v2339_v43 = vpop.f32.mrb[26].mxu0  ;;  %v1538_v32 = vld [vmem:[#allocation3] sm:$0x1] }
 0x1c5   : > { %v1632_v44 = vadd.f32 %v1631_v33, %v1601_v37  ;;  %v2371_v46 = vadd.f32 %v1441_v40, %v1269_v50  ;;  %v1561_v49 = vadd.f32 %v2368_v25, %v1560_v38  ;;  %v2305_v35 = vpop.f32.mrb[26].mxu1  ;;  %v1444_v51 = vpop.f32.mrb[27].mxu0  ;;  %v1578_v33 = vld [vmem:[#allocation4] sm:$0x1] }
 0x1c6   : > { %1532 = vst [vmem:[%s2885_s5 + $0xd0] sm:$0xff] %v2370_v42  ;;  %v2372_v53 = vadd.f32 %v2339_v43, %v2305_v35  ;;  %v1272_v45 = vpop.f32.mrb[27].mxu1  ;;  %v1605_v58 = vmul.f32 %v2370_v42, %v2370_v42 }
 0x1c7   : > { %1530 = vst [vmem:[%s2885_s5 + $0xc0] sm:$0xff] %v2371_v46  ;;  %v1562_v36 = vadd.f32 %v2371_v46, %v1561_v49  ;;  %v1603_v54 = vmul.f32 %v2371_v46, %v2371_v46  ;;  %v1633_v52 = vadd.f32 %v1632_v44, %v1602_v8  ;;  %v2373_v55 = vadd.f32 %v1444_v51, %v1272_v45 }
 0x1c8   : > { %1533 = vst [vmem:[%s2885_s5 + $0xd8] sm:$0xff] %v2372_v53  ;;  %v1606_v2 = vmul.f32 %v2372_v53, %v2372_v53 }
 0x1c9   : > { %v1634_v22 = vadd.f32 %v1633_v52, %v1603_v54  ;;  %1531 = vst [vmem:[%s2885_s5 + $0xc8] sm:$0xff] %v2373_v55  ;;  %v1563_v56 = vadd.f32 %v2373_v55, %v1562_v36  ;;  %v1604_v3 = vmul.f32 %v2373_v55, %v2373_v55  ;;  %v1661_v36 = vld [vmem:[%s3206_s2] sm:$0x1] (!%p2183_p5) }
 0x1ca   : > { %v2342_v57 = vpop.f32.mrb[28].mxu0 }
 0x1cb   : > { %v1564_v30 = vadd.f32 %v2370_v42, %v1563_v56  ;;  %v1635_v60 = vadd.f32 %v1634_v22, %v1604_v3  ;;  %v2308_v59 = vpop.f32.mrb[28].mxu1  ;;  %v1457_v23 = vpop.f32.mrb[29].mxu0  ;;  %v1665_v22 = vld [vmem:[%s3207_s3] sm:$0x1] (!%p2183_p5) }
 0x1cc   : > { %v2374_v62 = vadd.f32 %v2342_v57, %v2308_v59  ;;  %v1285_v0 = vpop.f32.mrb[29].mxu1  ;;  %v2343_v1 = vpop.f32.mrb[30].mxu0 }
 0x1cd   : > { %v1636_v4 = vadd.f32 %v1635_v60, %v1605_v58  ;;  %v2375_v41 = vadd.f32 %v1457_v23, %v1285_v0  ;;  %v1565_v6 = vadd.f32 %v2372_v53, %v1564_v30  ;;  %v2309_v63 = vpop.f32.mrb[30].mxu1  ;;  %v1460_v7 = vpop.f32.mrb[31].mxu0  ;;  %v1701_v53 = vlaneseq (!%p2183_p5) }
 0x1ce   : > { %1536 = vst [vmem:[%s2885_s5 + $0xf0] sm:$0xff] %v2374_v62  ;;  %v2376_v9 = vadd.f32 %v2343_v1, %v2309_v63  ;;  %v1288_v10 = vpop.f32.mrb[31].mxu1  ;;  %v1609_v17 = vmul.f32 %v2374_v62, %v2374_v62 }
 0x1cf   : > { %1534 = vst [vmem:[%s2885_s5 + $0xe0] sm:$0xff] %v2375_v41  ;;  %v1566_v11 = vadd.f32 %v2375_v41, %v1565_v6  ;;  %v1607_v12 = vmul.f32 %v2375_v41, %v2375_v41  ;;  %v1637_v19 = vadd.f32 %v1636_v4, %v1606_v2  ;;  %v2377_v13 = vadd.f32 %v1460_v7, %v1288_v10 }
 0x1d0   : > { %1537 = vst [vmem:[%s2885_s5 + $0xf8] sm:$0xff] %v2376_v9  ;;  %v1610_v61 = vmul.f32 %v2376_v9, %v2376_v9  ;;  %v1702_v45 = vshrl.u32 (!%p2183_p5), %v1701_v53, 7 }
 0x1d1   : > { %v1638_v39 = vadd.f32 %v1637_v19, %v1607_v12  ;;  %1535 = vst [vmem:[%s2885_s5 + $0xe8] sm:$0xff] %v2377_v13  ;;  %v1567_v14 = vadd.f32 %v2377_v13, %v1566_v11  ;;  %v1608_v16 = vmul.f32 %v2377_v13, %v2377_v13 }
 0x1d2   : > { %v1703_v54 = vsub.s32 (!%p2183_p5), 0, %v1702_v45 }
 0x1d3   : > { %v1568_v18 = vadd.f32 %v2374_v62, %v1567_v14  ;;  %v1639_v20 = vadd.f32 %v1638_v39, %v1608_v16 }
 0x1d5   : > { %v1569_v15 = vadd.f32 %v2376_v9, %v1568_v18  ;;  %v1640_v21 = vadd.f32 %v1639_v20, %v1609_v17 }
 0x1d7   : > { %v1570_v24 = vrot.slane %v1569_v15, 4  ;;  %v1641_v25 = vadd.f32 %v1640_v21, %v1610_v61 }
 0x1d8   : > { %v1684_v56 = vld [vmem:[#allocation2 + $0x80] sm:$0xff] (!%p2183_p5)  ;;  %v1685_v57 = vld [vmem:[#allocation2 + $0x88] sm:$0xff] (!%p2183_p5)  ;;  %v1686_v1 = vld [vmem:[#allocation2 + $0x90] sm:$0xff] (!%p2183_p5) }
 0x1d9   : > { %v1571_v26 = vadd.f32 %v1570_v24, %v1569_v15  ;;  %v1642_v47 = vrot.slane %v1641_v25, 4  ;;  %v1668_v3 = vld [vmem:[#allocation2] sm:$0xff] (!%p2183_p5)  ;;  %v1669_v60 = vld [vmem:[#allocation2 + $0x8] sm:$0xff] (!%p2183_p5)  ;;  %v1670_v2 = vld [vmem:[#allocation2 + $0x10] sm:$0xff] (!%p2183_p5) }
 0x1da   : > { %v1687_v12 = vld [vmem:[#allocation2 + $0x98] sm:$0xff] (!%p2183_p5)  ;;  %v1688_v15 = vld [vmem:[#allocation2 + $0xa0] sm:$0xff] (!%p2183_p5) }
 0x1db   : > { %v1572_v48 = vrot.slane %v1571_v26, 2  ;;  %v1643_v27 = vadd.f32 %v1642_v47, %v1641_v25  ;;  %v1671_v19 = vld [vmem:[#allocation2 + $0x18] sm:$0xff] (!%p2183_p5)  ;;  %v1672_v21 = vld [vmem:[#allocation2 + $0x20] sm:$0xff] (!%p2183_p5)  ;;  %v1673_v47 = vld [vmem:[#allocation2 + $0x28] sm:$0xff] (!%p2183_p5) }
 0x1dd   : > { %v1573_v28 = vadd.f32 %v1572_v48, %v1571_v26  ;;  %v1644_v29 = vrot.slane %v1643_v27, 2  ;;  %v1689_v26 = vld [vmem:[#allocation2 + $0xa8] sm:$0xff] (!%p2183_p5) }
 0x1df   : > { %v1574_v31 = vrot.slane %v1573_v28, 1  ;;  %v1645_v5 = vadd.f32 %v1644_v29, %v1643_v27 }
 0x1e1   : > { %v1575_v37 = vadd.f32 %v1574_v31, %v1573_v28  ;;  %v1646_v38 = vrot.slane %v1645_v5, 1  ;;  %1653 = sbr.rel (%p2183_p5) target bundleno = 724 (0x2d4), region = 44  ;;  %v1690_v31 = vld [vmem:[#allocation2 + $0xb0] sm:$0xff] (!%p2183_p5) }
 0x1e3   : > { %v1576_v34 = vadd.f32 %v1575_v37, %v1538_v32  ;;  %v1647_v40 = vadd.f32 %v1646_v38, %v1645_v5  ;;  %v1674_v5 = vld [vmem:[#allocation2 + $0x30] sm:$0xff] (!%p2183_p5) }
 0x1e5   : > { %1577 = vst [vmem:[#allocation3] sm:$0x1] %v1576_v34  ;;  %v1648_v42 = vadd.f32 %v1647_v40, %v1578_v33 }
 0x1e7   : > { %1649 = vst [vmem:[#allocation4] sm:$0x1] %v1648_v42 }
 0x1ec   : > { %v1654_v50 = vld [vmem:[#allocation3] sm:$0x1] }
 0x1ed   : > { %v1655_v8 = vmul.f32 0.001953125, %v1654_v50 }
 0x1ee   : > { %v1656_v43 = vld [vmem:[#allocation4] sm:$0x1] }
 0x1ef   : > { %v1657_v44 = vmul.f32 0.001953125, %v1656_v43  ;;  %v1658_v46 = vmul.f32 %v1655_v8, %v1655_v8  ;;  %v1691_v43 = vld [vmem:[#allocation2 + $0xb8] sm:$0xff] }
 0x1f1   : > { %v1659_v49 = vsub.f32 %v1657_v44, %v1658_v46 }
 0x1f3   : > { %v1660_v35 = vmax.f32 %v1659_v49, 0.0 }
 0x1f5   : > { %v1662_v51 = vadd.f32 1e-05, %v1660_v35 }
 0x1f7   : > { %2445 = vrsqrt.f32 %v1662_v51 }
 0x201   : > { %v2446_v52 = vpop.eup %2445 }
 0x202   : > { %v1664_v55 = vmul.f32 %v2446_v52, %v1661_v36  ;;  %v1893_v52 = vld [vmem:[#allocation2 + $0x180] sm:$0xff] }
 0x204   : > { %v1666_v58 = vmul.f32 %v1664_v55, %v1655_v8  ;;  %v2931_v30 = vrot.slane %v1664_v55, %v1703_v54  ;;  %v1675_v8 = vld [vmem:[#allocation2 + $0x38] sm:$0xff]  ;;  %v1877_v55 = vld [vmem:[#allocation2 + $0x100] sm:$0xff] }
 0x206   : > { %v1667_v59 = vsub.f32 %v1665_v22, %v1666_v58  ;;  %v1722_v23 = vmul.f32 %v2931_v30, %v1684_v56  ;;  %v1706_v62 = vmul.f32 %v2931_v30, %v1668_v3  ;;  %v1723_v0 = vmul.f32 %v2931_v30, %v1685_v57  ;;  %v1894_v22 = vld [vmem:[#allocation2 + $0x188] sm:$0xff]  ;;  %v1895_v3 = vld [vmem:[#allocation2 + $0x190] sm:$0xff] }
 0x207   : > { %v1707_v4 = vmul.f32 %v2931_v30, %v1669_v60  ;;  %v1724_v6 = vmul.f32 %v2931_v30, %v1686_v1  ;;  %v1708_v63 = vmul.f32 %v2931_v30, %v1670_v2  ;;  %v1725_v14 = vmul.f32 %v2931_v30, %v1687_v12  ;;  %v1878_v56 = vld [vmem:[#allocation2 + $0x108] sm:$0xff]  ;;  %v1880_v12 = vld [vmem:[#allocation2 + $0x118] sm:$0xff] }
 0x208   : > { %v2937_v41 = vrot.slane %v1667_v59, %v1703_v54  ;;  %v1709_v16 = vmul.f32 %v2931_v30, %v1671_v19  ;;  %v1726_v24 = vmul.f32 %v2931_v30, %v1688_v15  ;;  %v1710_v25 = vmul.f32 %v2931_v30, %v1672_v21  ;;  %v1692_v54 = vld [vmem:[#allocation2 + $0xc0] sm:$0xff] }
 0x209   : > { %v1727_v32 = vmul.f32 %v2931_v30, %v1689_v26  ;;  %v1711_v37 = vmul.f32 %v2931_v30, %v1673_v47  ;;  %v1728_v38 = vmul.f32 %v2931_v30, %v1690_v31  ;;  %v1712_v33 = vmul.f32 %v2931_v30, %v1674_v5  ;;  %v1899_v31 = vld [vmem:[#allocation2 + $0x1b0] sm:$0xff] }
 0x20a   : > { %v1760_v7 = vadd.f32 %v2937_v41, %v1722_v23  ;;  %v1744_v9 = vadd.f32 %v2937_v41, %v1706_v62  ;;  %v1761_v10 = vadd.f32 %v2937_v41, %v1723_v0  ;;  %v1745_v11 = vadd.f32 %v2937_v41, %v1707_v4  ;;  %v1676_v23 = vld [vmem:[#allocation2 + $0x40] sm:$0xff]  ;;  %v1879_v62 = vld [vmem:[#allocation2 + $0x110] sm:$0xff] }
 0x20b   : > { %v1762_v20 = vadd.f32 %v2937_v41, %v1724_v6  ;;  %v1746_v61 = vadd.f32 %v2937_v41, %v1708_v63  ;;  %v1763_v28 = vadd.f32 %v2937_v41, %v1725_v14  ;;  %v1747_v29 = vadd.f32 %v2937_v41, %v1709_v16  ;;  %v1896_v6 = vld [vmem:[#allocation2 + $0x198] sm:$0xff] }
 0x20c   : > { %v1792_v13 = vmax.f32 %v1760_v7, 0.0  ;;  %v1776_v39 = vmax.f32 %v1744_v9, 0.0  ;;  %v1793_v17 = vmax.f32 %v1761_v10, 0.0  ;;  %v1777_v18 = vmax.f32 %v1745_v11, 0.0  ;;  %v1693_v7 = vld [vmem:[#allocation2 + $0xc8] sm:$0xff] }
 0x20d   : > { %v1794_v48 = vmax.f32 %v1762_v20, 0.0  ;;  %v1778_v27 = vmax.f32 %v1746_v61, 0.0  ;;  %v1795_v34 = vmax.f32 %v1763_v28, 0.0  ;;  %v1779_v40 = vmax.f32 %v1747_v29, 0.0  ;;  %v1898_v28 = vld [vmem:[#allocation2 + $0x1a8] sm:$0xff] }
 0x20e   : > { %1840 = vxpose.xlu1.b32.start [1/16] (narrow) %v1792_v13, 16  ;;  %1808 = vxpose.xlu0.b32.start [1/16] (narrow) %v1776_v39, 16  ;;  %v1764_v42 = vadd.f32 %v2937_v41, %v1726_v24  ;;  %v1748_v50 = vadd.f32 %v2937_v41, %v1710_v25  ;;  %v1765_v44 = vadd.f32 %v2937_v41, %v1727_v32  ;;  %v1677_v13 = vld [vmem:[#allocation2 + $0x48] sm:$0xff]  ;;  %v1694_v39 = vld [vmem:[#allocation2 + $0xd0] sm:$0xff]  ;;  %v1897_v24 = vld [vmem:[#allocation2 + $0x1a0] sm:$0xff] }
 0x20f   : > { %v1749_v46 = vadd.f32 %v2937_v41, %v1711_v37  ;;  %v2962_v49 = vadd.f32 %v2937_v41, %v1728_v38  ;;  %v1729_v35 = vmul.f32 %v2931_v30, %v1691_v43  ;;  %v2966_v45 = vadd.f32 %v2937_v41, %v1712_v33  ;;  %v1881_v25 = vld [vmem:[#allocation2 + $0x120] sm:$0xff]  ;;  %v1882_v29 = vld [vmem:[#allocation2 + $0x128] sm:$0xff]  ;;  %v1883_v33 = vld [vmem:[#allocation2 + $0x130] sm:$0xff] }
 0x210   : > { %v1796_v51 = vmax.f32 %v1764_v42, 0.0  ;;  %v1780_v53 = vmax.f32 %v1748_v50, 0.0  ;;  %v1713_v36 = vmul.f32 %v2931_v30, %v1675_v8  ;;  %v1797_v57 = vmax.f32 %v1765_v44, 0.0  ;;  %v1900_v43 = vld [vmem:[#allocation2 + $0x1b8] sm:$0xff] }
 0x211   : > { %v1781_v58 = vmax.f32 %v1749_v46, 0.0  ;;  %v1798_v60 = vmax.f32 %v2962_v49, 0.0  ;;  %v2971_v59 = vadd.f32 %v2937_v41, %v1729_v35  ;;  %v1782_v0 = vmax.f32 %v2966_v45, 0.0  ;;  %v1884_v35 = vld [vmem:[#allocation2 + $0x138] sm:$0xff] }
 0x212   : > { %1841 = vxpose.xlu1.b32.cont [2/16] (narrow) %v1793_v17, 16  ;;  %1809 = vxpose.xlu0.b32.cont [2/16] (narrow) %v1777_v18, 16  ;;  %v2975_v1 = vadd.f32 %v2937_v41, %v1713_v36  ;;  %v1925_v2 = vmul.f32 %v1893_v52, %v2931_v30  ;;  %v1909_v4 = vmul.f32 %v1877_v55, %v2931_v30  ;;  %v1678_v18 = vld [vmem:[#allocation2 + $0x50] sm:$0xff]  ;;  %v1679_v52 = vld [vmem:[#allocation2 + $0x58] sm:$0xff] }
 0x213   : > { %v1730_v63 = vmul.f32 %v2931_v30, %v1692_v54  ;;  %v1926_v9 = vmul.f32 %v1894_v22, %v2931_v30  ;;  %v1910_v10 = vmul.f32 %v1878_v56, %v2931_v30  ;;  %v1927_v11 = vmul.f32 %v1895_v3, %v2931_v30 }
 0x214   : > { %v1714_v19 = vmul.f32 %v2931_v30, %v1676_v23  ;;  %v2985_v14 = vadd.f32 %v1925_v2, %v2937_v41  ;;  %v2988_v16 = vadd.f32 %v1909_v4, %v2937_v41  ;;  %v1911_v17 = vmul.f32 %v1879_v62, %v2931_v30  ;;  %v1903_v2 = vld [vmem:[#allocation2 + $0x1d0] sm:$0xff] }
 0x215   : > { %v2992_v20 = vadd.f32 %v1926_v9, %v2937_v41  ;;  %v2995_v61 = vadd.f32 %v1910_v10, %v2937_v41  ;;  %v2998_v15 = vadd.f32 %v1927_v11, %v2937_v41  ;;  %v1928_v21 = vmul.f32 %v1896_v6, %v2931_v30  ;;  %v1887_v9 = vld [vmem:[#allocation2 + $0x150] sm:$0xff] }
 0x216   : > { %1842 = vxpose.xlu1.b32.cont [3/16] (narrow) %v1794_v48, 16  ;;  %1810 = vxpose.xlu0.b32.cont [3/16] (narrow) %v1778_v27, 16  ;;  %v1799_v26 = vmax.f32 %v2971_v59, 0.0  ;;  %v1731_v47 = vmul.f32 %v2931_v30, %v1693_v7  ;;  %v3004_v48 = vadd.f32 %v1911_v17, %v2937_v41  ;;  %v1912_v27 = vmul.f32 %v1880_v12, %v2931_v30 }
 0x217   : > { %v3008_v5 = vadd.f32 %v2937_v41, %v1730_v63  ;;  %v1715_v32 = vmul.f32 %v2931_v30, %v1677_v13  ;;  %v1732_v37 = vmul.f32 %v2931_v30, %v1694_v39  ;;  %v3013_v38 = vadd.f32 %v1928_v21, %v2937_v41  ;;  %v1904_v13 = vld [vmem:[#allocation2 + $0x1d8] sm:$0xff] }
 0x218   : > { %v1929_v42 = vmul.f32 %v1897_v24, %v2931_v30  ;;  %v1913_v50 = vmul.f32 %v1881_v25, %v2931_v30  ;;  %v1716_v8 = vmul.f32 %v2931_v30, %v1678_v18  ;;  %v1930_v44 = vmul.f32 %v1898_v28, %v2931_v30  ;;  %v1888_v24 = vld [vmem:[#allocation2 + $0x158] sm:$0xff] }
 0x219   : > { %v1914_v46 = vmul.f32 %v1882_v29, %v2931_v30  ;;  %v1931_v49 = vmul.f32 %v1899_v31, %v2931_v30  ;;  %v1915_v54 = vmul.f32 %v1883_v33, %v2931_v30  ;;  %v1932_v3 = vmul.f32 %v1900_v43, %v2931_v30  ;;  %v1905_v33 = vld [vmem:[#allocation2 + $0x1e0] sm:$0xff] }
 0x21a   : > { %1843 = vxpose.xlu1.b32.cont [4/16] (narrow) %v1795_v34, 16  ;;  %1811 = vxpose.xlu0.b32.cont [4/16] (narrow) %v1779_v40, 16  ;;  %v1752_v34 = vadd.f32 %v2937_v41, %v1714_v19  ;;  %v3017_v40 = vadd.f32 %v1912_v27, %v2937_v41  ;;  %v3027_v45 = vadd.f32 %v1929_v42, %v2937_v41  ;;  %v1800_v4 = vmax.f32 %v3008_v5, 0.0  ;;  %v1906_v42 = vld [vmem:[#allocation2 + $0x1e8] sm:$0xff] }
 0x21b   : > { %v3030_v36 = vadd.f32 %v1913_v50, %v2937_v41  ;;  %v3034_v55 = vadd.f32 %v1930_v44, %v2937_v41  ;;  %v3037_v22 = vadd.f32 %v1914_v46, %v2937_v41  ;;  %v3040_v56 = vadd.f32 %v1931_v49, %v2937_v41  ;;  %v1890_v46 = vld [vmem:[#allocation2 + $0x168] sm:$0xff]  ;;  %v1907_v49 = vld [vmem:[#allocation2 + $0x1f0] sm:$0xff] }
 0x21c   : > { %v1753_v59 = vadd.f32 %v2937_v41, %v1715_v32  ;;  %v3046_v23 = vadd.f32 %v1915_v54, %v2937_v41  ;;  %v1916_v62 = vmul.f32 %v1884_v35, %v2931_v30  ;;  %v3051_v6 = vadd.f32 %v2937_v41, %v1732_v37 }
 0x21d   : > { %v3055_v7 = vadd.f32 %v1932_v3, %v2937_v41  ;;  %v1784_v10 = vmax.f32 %v1752_v34, 0.0  ;;  %v1717_v39 = vmul.f32 %v2931_v30, %v1679_v52  ;;  %v1935_v21 = vmul.f32 %v1903_v2, %v2931_v30  ;;  %v1889_v34 = vld [vmem:[#allocation2 + $0x160] sm:$0xff]  ;;  %v1891_v52 = vld [vmem:[#allocation2 + $0x170] sm:$0xff] }
 0x21e   : > { %1844 = vxpose.xlu1.b32.cont [5/16] (narrow) %v1796_v51, 16  ;;  %1812 = vxpose.xlu0.b32.cont [5/16] (narrow) %v1780_v53, 16  ;;  %v1783_v51 = vmax.f32 %v2975_v1, 0.0  ;;  %v1695_v53 = vld [vmem:[#allocation2 + $0xd8] sm:$0xff]  ;;  %v1886_v1 = vld [vmem:[#allocation2 + $0x148] sm:$0xff]  ;;  %v3058_v11 = vadd.f32 %v1916_v62, %v2937_v41  ;;  %v1754_v25 = vadd.f32 %v2937_v41, %v1716_v8  ;;  %v1919_v29 = vmul.f32 %v1887_v9, %v2931_v30 }
 0x21f   : > { %v1733_v63 = vmul.f32 %v2931_v30, %v1695_v53  ;;  %v1918_v18 = vmul.f32 %v1886_v1, %v2931_v30  ;;  %v3081_v32 = vadd.f32 %v1935_v21, %v2937_v41  ;;  %v1936_v37 = vmul.f32 %v1904_v13, %v2931_v30  ;;  %v1681_v9 = vld [vmem:[#allocation2 + $0x68] sm:$0xff] }
 0x220   : > { %v1785_v43 = vmax.f32 %v1753_v59, 0.0  ;;  %v3085_v8 = vadd.f32 %v1919_v29, %v2937_v41  ;;  %v1920_v44 = vmul.f32 %v1888_v24, %v2931_v30  ;;  %v1802_v35 = vmax.f32 %v3051_v6, 0.0  ;;  %v1908_v59 = vld [vmem:[#allocation2 + $0x1f8] sm:$0xff] }
 0x221   : > { %v3078_v5 = vadd.f32 %v1918_v18, %v2937_v41  ;;  %v1755_v53 = vadd.f32 %v2937_v41, %v1717_v39  ;;  %v3092_v54 = vadd.f32 %v1936_v37, %v2937_v41  ;;  %v1922_v1 = vmul.f32 %v1890_v46, %v2931_v30 }
 0x222   : > { %1845 = vxpose.xlu1.b32.cont [6/16] (narrow) %v1797_v57, 16  ;;  %1813 = vxpose.xlu0.b32.cont [6/16] (narrow) %v1781_v58, 16  ;;  %v1901_v57 = vld [vmem:[#allocation2 + $0x1c0] sm:$0xff]  ;;  %v1939_v2 = vmul.f32 %v1907_v49, %v2931_v30  ;;  %v1786_v6 = vmax.f32 %v1754_v25, 0.0  ;;  %v1940_v18 = vmul.f32 %v1908_v59, %v2931_v30 }
 0x223   : > { %v1885_v58 = vld [vmem:[#allocation2 + $0x140] sm:$0xff]  ;;  %v1933_v12 = vmul.f32 %v1901_v57, %v2931_v30  ;;  %v3096_v57 = vadd.f32 %v1920_v44, %v2937_v41  ;;  %v3115_v39 = vadd.f32 %v1922_v1, %v2937_v41  ;;  %v1787_v37 = vmax.f32 %v1755_v53, 0.0 }
 0x224   : > { %v1917_v19 = vmul.f32 %v1885_v58, %v2931_v30  ;;  %v1937_v58 = vmul.f32 %v1905_v33, %v2931_v30  ;;  %v3128_v29 = vadd.f32 %v1940_v18, %v2937_v41  ;;  %v1989_v18 = vmax.f32 %v2985_v14, 0.0 }
 0x225   : > { %v3068_v27 = vadd.f32 %v1933_v12, %v2937_v41  ;;  %v1976_v14 = vmax.f32 %v3017_v40, 0.0  ;;  %v1996_v40 = vmax.f32 %v3055_v7, 0.0  ;;  %v1983_v7 = vmax.f32 %v3085_v8, 0.0 }
 0x226   : > { %1846 = vxpose.xlu1.b32.cont [7/16] (narrow) %v1798_v60, 16  ;;  %1814 = vxpose.xlu0.b32.cont [7/16] (narrow) %v1782_v0, 16  ;;  %v1769_v60 = vadd.f32 %v2937_v41, %v1731_v47  ;;  %v1902_v0 = vld [vmem:[#allocation2 + $0x1c8] sm:$0xff]  ;;  %v1680_v47 = vld [vmem:[#allocation2 + $0x60] sm:$0xff]  ;;  %v3071_v28 = vadd.f32 %v1917_v19, %v2937_v41  ;;  %v1923_v19 = vmul.f32 %v1891_v52, %v2931_v30  ;;  %v1699_v52 = vld [vmem:[#allocation2 + $0xf8] sm:$0xff] }
 0x227   : > { %v1934_v17 = vmul.f32 %v1902_v0, %v2931_v30  ;;  %v1718_v62 = vmul.f32 %v2931_v30, %v1680_v47  ;;  %v1938_v0 = vmul.f32 %v1906_v42, %v2931_v30  ;;  %v1719_v47 = vmul.f32 %v2931_v30, %v1681_v9  ;;  %v1698_v42 = vld [vmem:[#allocation2 + $0xf0] sm:$0xff] }
 0x228   : > { %v1801_v50 = vmax.f32 %v1769_v60, 0.0  ;;  %v1921_v60 = vmul.f32 %v1889_v34, %v2931_v30  ;;  %v3122_v21 = vadd.f32 %v1923_v19, %v2937_v41  ;;  %v1736_v44 = vmul.f32 %v2931_v30, %v1698_v42 }
 0x229   : > { %v3075_v31 = vadd.f32 %v1934_v17, %v2937_v41  ;;  %v3112_v13 = vadd.f32 %v1938_v0, %v2937_v41  ;;  %v3118_v17 = vadd.f32 %v1939_v2, %v2937_v41  ;;  %v1756_v34 = vadd.f32 %v2937_v41, %v1718_v62 }
 0x22a   : > { %1847 = vxpose.xlu1.b32.cont [8/16] (narrow) %v1799_v26, 16  ;;  %1815 = vxpose.xlu0.b32.cont [8/16] (narrow) %v1783_v51, 16  ;;  %v1696_v26 = vld [vmem:[#allocation2 + $0xe0] sm:$0xff]  ;;  %v1771_v51 = vadd.f32 %v2937_v41, %v1733_v63  ;;  %v1697_v63 = vld [vmem:[#allocation2 + $0xe8] sm:$0xff]  ;;  %v3108_v12 = vadd.f32 %v1921_v60, %v2937_v41  ;;  %v1757_v53 = vadd.f32 %v2937_v41, %v1719_v47  ;;  %v1992_v47 = vmax.f32 %v3013_v38, 0.0 }
 0x22b   : > { %v1734_v3 = vmul.f32 %v2931_v30, %v1696_v26  ;;  %v1735_v26 = vmul.f32 %v2931_v30, %v1697_v63  ;;  %v1737_v60 = vmul.f32 %v2931_v30, %v1699_v52  ;;  %v1979_v38 = vmax.f32 %v3046_v23, 0.0 }
 0x22c   : > { %v1803_v25 = vmax.f32 %v1771_v51, 0.0  ;;  %v1788_v51 = vmax.f32 %v1756_v34, 0.0  ;;  %v1789_v62 = vmax.f32 %v1757_v53, 0.0  ;;  %v1999_v23 = vmax.f32 %v3081_v32, 0.0 }
 0x22d   : > { %v1772_v33 = vadd.f32 %v2937_v41, %v1734_v3  ;;  %v1683_v3 = vld [vmem:[#allocation2 + $0x78] sm:$0xff]  ;;  %v1986_v32 = vmax.f32 %v3115_v39, 0.0  ;;  %v2003_v8 = vmax.f32 %v3118_v17, 0.0 }
 0x22e   : > { %1848 = vxpose.xlu1.b32.cont [9/16] (narrow) %v1800_v4, 16  ;;  %1816 = vxpose.xlu0.b32.cont [9/16] (narrow) %v1784_v10, 16  ;;  %v1892_v4 = vld [vmem:[#allocation2 + $0x178] sm:$0xff]  ;;  %v3105_v10 = vadd.f32 %v1937_v58, %v2937_v41  ;;  %v1774_v58 = vadd.f32 %v2937_v41, %v1736_v44  ;;  %v1721_v1 = vmul.f32 %v2931_v30, %v1683_v3 }
 0x22f   : > { %v1924_v24 = vmul.f32 %v1892_v4, %v2931_v30  ;;  %v1804_v49 = vmax.f32 %v1772_v33, 0.0 }
 0x230   : > { %v1806_v2 = vmax.f32 %v1774_v58, 0.0  ;;  %v1759_v63 = vadd.f32 %v2937_v41, %v1721_v1 }
 0x232   : > { %1849 = vxpose.xlu1.b32.cont [10/16] (narrow) %v1801_v50, 16  ;;  %1817 = vxpose.xlu0.b32.cont [10/16] (narrow) %v1785_v43, 16  ;;  %v1682_v50 = vld [vmem:[#allocation2 + $0x70] sm:$0xff]  ;;  %v3133_v43 = vadd.f32 %v1924_v24, %v2937_v41  ;;  %v1791_v19 = vmax.f32 %v1759_v63, 0.0  ;;  %v1973_v24 = vmax.f32 %v2988_v16, 0.0  ;;  %v1993_v16 = vmax.f32 %v3027_v45, 0.0 }
 0x233   : > { %v1720_v46 = vmul.f32 %v2931_v30, %v1682_v50  ;;  %v1990_v30 = vmax.f32 %v2992_v20, 0.0  ;;  %v1977_v20 = vmax.f32 %v3030_v36, 0.0  ;;  %v1980_v45 = vmax.f32 %v3058_v11, 0.0 }
 0x234   : > { %v1997_v36 = vmax.f32 %v3068_v27, 0.0  ;;  %v2000_v11 = vmax.f32 %v3092_v54, 0.0  ;;  %v1984_v27 = vmax.f32 %v3096_v57, 0.0  ;;  %v1987_v54 = vmax.f32 %v3122_v21, 0.0 }
 0x235   : > { %v1758_v0 = vadd.f32 %v2937_v41, %v1720_v46  ;;  %v2004_v57 = vmax.f32 %v3128_v29, 0.0 }
 0x236   : > { %1850 = vxpose.xlu1.b32.cont [11/16] (narrow) %v1802_v35, 16  ;;  %1818 = vxpose.xlu0.b32.cont [11/16] (narrow) %v1786_v6, 16  ;;  %v1773_v35 = vadd.f32 %v2937_v41, %v1735_v26  ;;  %v1775_v6 = vadd.f32 %v2937_v41, %v1737_v60  ;;  %v1991_v41 = vmax.f32 %v2998_v15, 0.0  ;;  %v1975_v26 = vmax.f32 %v3004_v48, 0.0 }
 0x237   : > { %v1790_v4 = vmax.f32 %v1758_v0, 0.0  ;;  %v1978_v15 = vmax.f32 %v3037_v22, 0.0  ;;  %v1995_v48 = vmax.f32 %v3040_v56, 0.0  ;;  %v1998_v22 = vmax.f32 %v3075_v31, 0.0 }
 0x238   : > { %v1805_v59 = vmax.f32 %v1773_v35, 0.0  ;;  %v1807_v9 = vmax.f32 %v1775_v6, 0.0  ;;  %v1982_v56 = vmax.f32 %v3078_v5, 0.0  ;;  %v1985_v31 = vmax.f32 %v3108_v12, 0.0 }
 0x239   : > { %v2002_v5 = vmax.f32 %v3112_v13, 0.0 }
 0x23a   : > { %1851 = vxpose.xlu1.b32.cont [12/16] (narrow) %v1803_v25, 16  ;;  %1819 = vxpose.xlu0.b32.cont [12/16] (narrow) %v1787_v37, 16  ;;  %v1974_v25 = vmax.f32 %v2995_v61, 0.0  ;;  %v1994_v61 = vmax.f32 %v3034_v55, 0.0  ;;  %v1981_v55 = vmax.f32 %v3071_v28, 0.0  ;;  %v2001_v28 = vmax.f32 %v3105_v10, 0.0 }
 0x23b   : > { %v1988_v10 = vmax.f32 %v3133_v43, 0.0 }
 0x23e   : > { %1852 = vxpose.xlu1.b32.cont [13/16] (narrow) %v1804_v49, 16  ;;  %1820 = vxpose.xlu0.b32.cont [13/16] (narrow) %v1788_v51, 16 }
 0x242   : > { %1853 = vxpose.xlu1.b32.cont [14/16] (narrow) %v1805_v59, 16  ;;  %1821 = vxpose.xlu0.b32.cont [14/16] (narrow) %v1789_v62, 16 }
 0x246   : > { %1854 = vxpose.xlu1.b32.cont [15/16] (narrow) %v1806_v2, 16  ;;  %1822 = vxpose.xlu0.b32.cont [15/16] (narrow) %v1790_v4, 16 }
 0x24a   : > { %1855 = vxpose.xlu1.b32.end [16/16] (narrow) %v1807_v9, 16  ;;  %1823 = vxpose.xlu0.b32.end [16/16] (narrow) %v1791_v19, 16 }
 0x24e   : > { %2037 = vxpose.xlu1.b32.start [1/16] (narrow) %v1989_v18, 16  ;;  %2005 = vxpose.xlu0.b32.start [1/16] (narrow) %v1973_v24, 16 }
 0x252   : > { %2038 = vxpose.xlu1.b32.cont [2/16] (narrow) %v1990_v30, 16  ;;  %2006 = vxpose.xlu0.b32.cont [2/16] (narrow) %v1974_v25, 16 }
 0x256   : > { %2039 = vxpose.xlu1.b32.cont [3/16] (narrow) %v1991_v41, 16  ;;  %2007 = vxpose.xlu0.b32.cont [3/16] (narrow) %v1975_v26, 16 }
 0x25a   : > { %2040 = vxpose.xlu1.b32.cont [4/16] (narrow) %v1992_v47, 16  ;;  %2008 = vxpose.xlu0.b32.cont [4/16] (narrow) %v1976_v14, 16 }
 0x25e   : > { %2041 = vxpose.xlu1.b32.cont [5/16] (narrow) %v1993_v16, 16  ;;  %2009 = vxpose.xlu0.b32.cont [5/16] (narrow) %v1977_v20, 16 }
 0x262   : > { %2042 = vxpose.xlu1.b32.cont [6/16] (narrow) %v1994_v61, 16  ;;  %2010 = vxpose.xlu0.b32.cont [6/16] (narrow) %v1978_v15, 16 }
 0x266   : > { %2043 = vxpose.xlu1.b32.cont [7/16] (narrow) %v1995_v48, 16  ;;  %2011 = vxpose.xlu0.b32.cont [7/16] (narrow) %v1979_v38, 16 }
 0x26a   : > { %2044 = vxpose.xlu1.b32.cont [8/16] (narrow) %v1996_v40, 16  ;;  %2012 = vxpose.xlu0.b32.cont [8/16] (narrow) %v1980_v45, 16 }
 0x26e   : > { %2045 = vxpose.xlu1.b32.cont [9/16] (narrow) %v1997_v36, 16  ;;  %2013 = vxpose.xlu0.b32.cont [9/16] (narrow) %v1981_v55, 16 }
 0x272   : > { %2046 = vxpose.xlu1.b32.cont [10/16] (narrow) %v1998_v22, 16  ;;  %2014 = vxpose.xlu0.b32.cont [10/16] (narrow) %v1982_v56, 16 }
 0x276   : > { %2047 = vxpose.xlu1.b32.cont [11/16] (narrow) %v1999_v23, 16  ;;  %2015 = vxpose.xlu0.b32.cont [11/16] (narrow) %v1983_v7, 16 }
 0x27a   : > { %2048 = vxpose.xlu1.b32.cont [12/16] (narrow) %v2000_v11, 16  ;;  %2016 = vxpose.xlu0.b32.cont [12/16] (narrow) %v1984_v27, 16 }
 0x27e   : > { %2049 = vxpose.xlu1.b32.cont [13/16] (narrow) %v2001_v28, 16  ;;  %2017 = vxpose.xlu0.b32.cont [13/16] (narrow) %v1985_v31, 16 }
 0x282   : > { %2050 = vxpose.xlu1.b32.cont [14/16] (narrow) %v2002_v5, 16  ;;  %2018 = vxpose.xlu0.b32.cont [14/16] (narrow) %v1986_v32, 16 }
 0x286   : > { %2051 = vxpose.xlu1.b32.cont [15/16] (narrow) %v2003_v8, 16  ;;  %2019 = vxpose.xlu0.b32.cont [15/16] (narrow) %v1987_v54, 16 }
 0x28a   : > { %2052 = vxpose.xlu1.b32.end [16/16] (narrow) %v2004_v57, 16  ;;  %2020 = vxpose.xlu0.b32.end [16/16] (narrow) %v1988_v10, 16 }
 0x28e   : > { %v1856_v12 = vpop.trf.xlu1  ;;  %v1824_v37 = vpop.trf.xlu0 }
 0x28f   : > { %1873 = vst [vmem:[%s3208_s4 + $0x8] sm:$0xff] %v1856_v12  ;;  %1872 = vst [vmem:[%s3208_s4] sm:$0xff] %v1824_v37 }
 0x292   : > { %v1857_v13 = vpop.trf.xlu1  ;;  %v1825_v39 = vpop.trf.xlu0 }
 0x293   : > { %1875 = vst [vmem:[%s3208_s4 + $0x18] sm:$0xff] %v1857_v13  ;;  %1874 = vst [vmem:[%s3208_s4 + $0x10] sm:$0xff] %v1825_v39 }
 0x2ce   : > { %v2053_v17 = vpop.trf.xlu1  ;;  %v2021_v21 = vpop.trf.xlu0 }
 0x2cf   : > { %2185 = vst [vmem:[%s3208_s4 + $0x28] sm:$0xff] %v2053_v17  ;;  %2184 = vst [vmem:[%s3208_s4 + $0x20] sm:$0xff] %v2021_v21 }
 0x2d2   : > { %v2054_v29 = vpop.trf.xlu1  ;;  %v2022_v33 = vpop.trf.xlu0 }
 0x2d3   : > { %2187 = vst [vmem:[%s3208_s4 + $0x38] sm:$0xff] %v2054_v29  ;;  %2186 = vst [vmem:[%s3208_s4 + $0x30] sm:$0xff] %v2022_v33 }
 0x2d4 PF: > { %s14_s15 = sadd.s32 1, %s2453_s15  }
 0x2d5   : > { %p11_p6 = scmp.ge.s32.totalorder %s14_s15, 4  }
 0x2d7   :  { %13 = sbr.rel (!%p11_p6) target bundleno = 1 (0x1), region = 75 }

</bundles_post_ra>
